<compile_context>
chip_gen: v5e
topology: v5e:2x2
jax: 0.10.0
libtpu: 0.0.40
codegen_flags: <defaults>
</compile_context>

<pallas_src>
import functools

import jax
import jax.numpy as jnp
from jax import lax
from jax.experimental import pallas as pl
from jax.experimental.pallas import tpu as pltpu

# ---- model / neuron constants (norse defaults, dt = 0.001) -----------------
DT = 0.001
TAU_SYN_INV = 1.0 / 5e-3   # 200.0
TAU_MEM_INV = 1.0 / 1e-2   # 100.0
V_LEAK = 0.0
V_TH = 1.0
V_RESET = 0.0

SENSORY_SIZE = 4
CONTEXT_SIZE = 1
IN_SIZE = SENSORY_SIZE + CONTEXT_SIZE   # 5
HIDDEN_SIZE = 32
OUTPUT_SIZE = 2
EI_RATIO = 0.8


# ---------------------------------------------------------------------------
# Pallas kernel: one grid step == one chunk of T_CHUNK timesteps.
# State persists across chunks in tiny VMEM scratch; inside the chunk it is
# loop-carried in registers.
# ---------------------------------------------------------------------------
def _snn_chunk_kernel(xp_ref, w_comb_ref,
                      hid_ref, ro_ref,
                      z_s, v_s, i_s, vo_s, io_s,
                      *, t_chunk, hidden):
    c = pl.program_id(0)

    @pl.when(c == 0)
    def _init():
        z_s[...] = jnp.zeros_like(z_s)
        v_s[...] = jnp.zeros_like(v_s)
        i_s[...] = jnp.zeros_like(i_s)
        vo_s[...] = jnp.zeros_like(vo_s)
        io_s[...] = jnp.zeros_like(io_s)

    # Combined [W_rec | W_out] -> (H, H+O); VMEM-resident for the whole grid.
    w_comb = w_comb_ref[...]

    def step(t, carry):
        z, v, i, vo, io = carry

        # ---- recurrent LIF layer (l1) --------------------------------------
        v_dec = v + DT * TAU_MEM_INV * ((V_LEAK - v) + i)
        i_dec = i + (-DT * TAU_SYN_INV) * i
        z_new = (v_dec > V_TH).astype(jnp.float32)           # spikes
        v_new = (1.0 - z_new) * v_dec + z_new * V_RESET      # reset

        # single fused MXU push: recurrent synapse + linear readout
        proj = jnp.dot(z_new, w_comb, preferred_element_type=jnp.float32)
        syn = proj[:, :hidden]          # (B, H)
        y = proj[:, hidden:]            # (B, O)  -- fc_out(z), no bias

        # input projection x @ W_in was hoisted out of the loop (xp_ref)
        i_new = i_dec + xp_ref[t] + syn

        # ---- leaky-integrator feed-forward cell (out) ----------------------
        vo_new = vo + DT * TAU_MEM_INV * ((V_LEAK - vo) + io)
        io_new = io + (-DT * TAU_SYN_INV) * io + y

        # ---- recordings (whole chunk stays in VMEM, one DMA per chunk) -----
        hid_ref[t, 0] = z_new
        hid_ref[t, 1] = v_new
        hid_ref[t, 2] = i_new
        ro_ref[t, 0] = vo_new            # readout.v == returned voltages
        ro_ref[t, 1] = io_new            # readout.i

        return (z_new, v_new, i_new, vo_new, io_new)

    carry0 = (z_s[...], v_s[...], i_s[...], vo_s[...], io_s[...])
    z, v, i, vo, io = lax.fori_loop(0, t_chunk, step, carry0, unroll=True)

    # carry state to the next chunk
    z_s[...] = z
    v_s[...] = v
    i_s[...] = i
    vo_s[...] = vo
    io_s[...] = io


def _pick_chunk(seq_len, max_chunk=64):
    """Largest divisor of seq_len not exceeding max_chunk (static, trace-time)."""
    for c in range(min(seq_len, max_chunk), 0, -1):
        if seq_len % c == 0:
            return c
    return 1


# ---------------------------------------------------------------------------
# Wrapper
# ---------------------------------------------------------------------------
@jax.jit
def snn_forward(x, w_in_t, w_rec_t, w_out_t):
    """x: (T, B, IN) float32.
    Returns (voltages, z_rec, v_rec, i_rec, vo_rec, io_rec)."""
    T, B, _ = x.shape
    H = w_rec_t.shape[0]
    O = w_out_t.shape[1]

    # Hoist the (recurrence-free) input projection out of the time loop.
    x_proj = jnp.einsum('tbi,ih->tbh', x, w_in_t,
                        preferred_element_type=jnp.float32)        # (T, B, H)

    # Fuse recurrent + readout weights so each step is a single matmul.
    w_comb = jnp.concatenate([w_rec_t, w_out_t], axis=1)           # (H, H+O)

    t_chunk = _pick_chunk(T)
    num_chunks = T // t_chunk

    kernel = functools.partial(_snn_chunk_kernel, t_chunk=t_chunk, hidden=H)

    out_shape = (
        jax.ShapeDtypeStruct((T, 3, B, H), jnp.float32),   # [z, v, i]
        jax.ShapeDtypeStruct((T, 2, B, O), jnp.float32),   # [readout.v, readout.i]
    )

    grid_spec = pltpu.PrefetchScalarGridSpec(
        num_scalar_prefetch=0,
        grid=(num_chunks,),
        in_specs=[
            pl.BlockSpec((t_chunk, B, H), lambda c: (c, 0, 0)),     # x_proj chunk
            pl.BlockSpec((H, H + O), lambda c: (0, 0)),             # fused weights
        ],
        out_specs=[
            pl.BlockSpec((t_chunk, 3, B, H), lambda c: (c, 0, 0, 0)),
            pl.BlockSpec((t_chunk, 2, B, O), lambda c: (c, 0, 0, 0)),
        ],
        scratch_shapes=[
            pltpu.VMEM((B, H), jnp.float32),   # z  (carried across chunks)
            pltpu.VMEM((B, H), jnp.float32),   # v
            pltpu.VMEM((B, H), jnp.float32),   # i
            pltpu.VMEM((B, O), jnp.float32),   # vo
            pltpu.VMEM((B, O), jnp.float32),   # io
        ],
    )

    hid, ro = pl.pallas_call(
        kernel,
        out_shape=out_shape,
        grid_spec=grid_spec,
        compiler_params=pltpu.CompilerParams(
            dimension_semantics=("arbitrary",)),   # recurrence -> sequential
    )(x_proj, w_comb)

    voltages = ro[:, 0]
    return voltages, hid[:, 0], hid[:, 1], hid[:, 2], ro[:, 0], ro[:, 1]


# ---------------------------------------------------------------------------
# Pure-JAX reference (same math) for a correctness check.
# ---------------------------------------------------------------------------
def snn_forward_ref(x, w_in_t, w_rec_t, w_out_t):
    T, B, _ = x.shape
    H = w_in_t.shape[1]
    O = w_out_t.shape[1]
    x_proj = jnp.einsum('tbi,ih->tbh', x, w_in_t,
                        preferred_element_type=jnp.float32)

    def step(carry, xp_t):
        z, v, i, vo, io = carry
        v_dec = v + DT * TAU_MEM_INV * ((V_LEAK - v) + i)
        i_dec = i + (-DT * TAU_SYN_INV) * i
        z_new = (v_dec > V_TH).astype(jnp.float32)
        v_new = (1.0 - z_new) * v_dec + z_new * V_RESET
        i_new = i_dec + xp_t + z_new @ w_rec_t
        y = z_new @ w_out_t
        vo_new = vo + DT * TAU_MEM_INV * ((V_LEAK - vo) + io)
        io_new = io + (-DT * TAU_SYN_INV) * io + y
        return (z_new, v_new, i_new, vo_new, io_new), vo_new

    init = (jnp.zeros((B, H), jnp.float32), jnp.zeros((B, H), jnp.float32),
            jnp.zeros((B, H), jnp.float32), jnp.zeros((B, O), jnp.float32),
            jnp.zeros((B, O), jnp.float32))
    _, volts = jax.lax.scan(step, init, x_proj)
    return volts


# ---------------------------------------------------------------------------
def make_params(key):
    k1, k2, k3 = jax.random.split(key, 3)
    # input weights: (H, IN) in torch convention -> transpose to (IN, H)
    w_in = jax.random.normal(k1, (HIDDEN_SIZE, IN_SIZE), jnp.float32) / jnp.sqrt(IN_SIZE)
    # recurrent weights with Dale's law / EI ratio 0.8 on presynaptic units
    w_rec = jnp.abs(jax.random.normal(k2, (HIDDEN_SIZE, HIDDEN_SIZE), jnp.float32)) / jnp.sqrt(HIDDEN_SIZE)
    n_exc = int(EI_RATIO * HIDDEN_SIZE)
    sign = jnp.concatenate([jnp.ones((n_exc,)), -jnp.ones((HIDDEN_SIZE - n_exc,))])
    w_rec = w_rec * sign[None, :]          # column = presynaptic unit in torch layout
    # fc_out weights: (O, H) torch -> (H, O)
    w_out = jax.random.normal(k3, (OUTPUT_SIZE, HIDDEN_SIZE), jnp.float32) / jnp.sqrt(HIDDEN_SIZE)
    return w_in.T, w_rec.T, w_out.T        # (IN,H), (H,H), (H,O)


if __name__ == "__main__":
    key = jax.random.PRNGKey(0)
    kx, kp = jax.random.split(key)

    T, B = 8, 8
    # Scale inputs up so at least some neurons actually spike within 8 steps.
    x = 10.0 * jax.random.normal(kx, (T, B, IN_SIZE), jnp.float32)

    w_in_t, w_rec_t, w_out_t = make_params(kp)

    outs = jax.block_until_ready(snn_forward(x, w_in_t, w_rec_t, w_out_t))
    voltages, z_rec, v_rec, i_rec, vo_rec, io_rec = outs

    # correctness check against pure-JAX scan reference
    volts_ref = jax.block_until_ready(snn_forward_ref(x, w_in_t, w_rec_t, w_out_t))
    assert voltages.shape == (T, B, OUTPUT_SIZE)
    assert z_rec.shape == (T, B, HIDDEN_SIZE)
    assert v_rec.shape == (T, B, HIDDEN_SIZE)
    assert i_rec.shape == (T, B, HIDDEN_SIZE)
    assert vo_rec.shape == (T, B, OUTPUT_SIZE)
    assert io_rec.shape == (T, B, OUTPUT_SIZE)
    assert jnp.allclose(voltages, volts_ref, rtol=1e-4, atol=1e-4)

    print("KERNEL_OK")
</pallas_src>

<mosaic_0001>
module attributes {stable_mosaic.version = 11 : i64} {
  func.func @_snn_chunk_kernel(%arg0: i32, %arg1: memref<8x8x32xf32, #tpu.memory_space<vmem>>, %arg2: memref<32x34xf32, #tpu.memory_space<vmem>>, %arg3: memref<8x3x8x32xf32, #tpu.memory_space<vmem>>, %arg4: memref<8x2x8x2xf32, #tpu.memory_space<vmem>>, %arg5: memref<8x32xf32, #tpu.memory_space<vmem>>, %arg6: memref<8x32xf32, #tpu.memory_space<vmem>>, %arg7: memref<8x32xf32, #tpu.memory_space<vmem>>, %arg8: memref<8x2xf32, #tpu.memory_space<vmem>>, %arg9: memref<8x2xf32, #tpu.memory_space<vmem>>) attributes {dimension_semantics = [#tpu.dimension_semantics<arbitrary>], iteration_bounds = array<i64: 1>, scalar_prefetch = 0 : i64, scratch_operands = 5 : i64, tpu.core_type = #tpu.core_type<tc>, window_params = [{transform_indices = @transform_0, window_bounds = array<i64: 8, 8, 32>}, {pipeline_mode = #tpu.pipeline_mode<synchronous>, transform_indices = @transform_1, window_bounds = array<i64: 32, 34>}, {transform_indices = @transform_2, window_bounds = array<i64: 8, 3, 8, 32>}, {transform_indices = @transform_3, window_bounds = array<i64: 8, 2, 8, 2>}]} {
    %c0_i32 = arith.constant 0 : i32
    %0 = arith.cmpi eq, %arg0, %c0_i32 : i32
    %1 = arith.extui %0 : i1 to i32
    %c0_i32_0 = arith.constant 0 : i32
    %2 = arith.cmpi ne, %1, %c0_i32_0 : i32
    scf.if %2 {
      %cst_236 = arith.constant 0.000000e+00 : f32
      %470 = vector.broadcast %cst_236 : f32 to vector<8x32xf32>
      %c0_237 = arith.constant 0 : index
      %c0_238 = arith.constant 0 : index
      %471 = vector.load %arg5[%c0_237, %c0_238] : memref<8x32xf32, #tpu.memory_space<vmem>>, vector<8x32xf32>
      tpu.vector_store %arg5[%c0_237, %c0_238], %470 {strides = array<i32>} : memref<8x32xf32, #tpu.memory_space<vmem>>, vector<8x32xf32>,
      %cst_239 = arith.constant 0.000000e+00 : f32
      %472 = vector.broadcast %cst_239 : f32 to vector<8x32xf32>
      %c0_240 = arith.constant 0 : index
      %c0_241 = arith.constant 0 : index
      %473 = vector.load %arg6[%c0_240, %c0_241] : memref<8x32xf32, #tpu.memory_space<vmem>>, vector<8x32xf32>
      tpu.vector_store %arg6[%c0_240, %c0_241], %472 {strides = array<i32>} : memref<8x32xf32, #tpu.memory_space<vmem>>, vector<8x32xf32>,
      %cst_242 = arith.constant 0.000000e+00 : f32
      %474 = vector.broadcast %cst_242 : f32 to vector<8x32xf32>
      %c0_243 = arith.constant 0 : index
      %c0_244 = arith.constant 0 : index
      %475 = vector.load %arg7[%c0_243, %c0_244] : memref<8x32xf32, #tpu.memory_space<vmem>>, vector<8x32xf32>
      tpu.vector_store %arg7[%c0_243, %c0_244], %474 {strides = array<i32>} : memref<8x32xf32, #tpu.memory_space<vmem>>, vector<8x32xf32>,
      %cst_245 = arith.constant 0.000000e+00 : f32
      %476 = vector.broadcast %cst_245 : f32 to vector<8x2xf32>
      %c0_246 = arith.constant 0 : index
      %c0_247 = arith.constant 0 : index
      %477 = vector.load %arg8[%c0_246, %c0_247] : memref<8x2xf32, #tpu.memory_space<vmem>>, vector<8x2xf32>
      tpu.vector_store %arg8[%c0_246, %c0_247], %476 {strides = array<i32>} : memref<8x2xf32, #tpu.memory_space<vmem>>, vector<8x2xf32>,
      %cst_248 = arith.constant 0.000000e+00 : f32
      %478 = vector.broadcast %cst_248 : f32 to vector<8x2xf32>
      %c0_249 = arith.constant 0 : index
      %c0_250 = arith.constant 0 : index
      %479 = vector.load %arg9[%c0_249, %c0_250] : memref<8x2xf32, #tpu.memory_space<vmem>>, vector<8x2xf32>
      tpu.vector_store %arg9[%c0_249, %c0_250], %478 {strides = array<i32>} : memref<8x2xf32, #tpu.memory_space<vmem>>, vector<8x2xf32>,
    } else {
    }
    %c0 = arith.constant 0 : index
    %c0_1 = arith.constant 0 : index
    %3 = vector.load %arg2[%c0, %c0_1] : memref<32x34xf32, #tpu.memory_space<vmem>>, vector<32x34xf32>
    %c0_2 = arith.constant 0 : index
    %c0_3 = arith.constant 0 : index
    %4 = vector.load %arg5[%c0_2, %c0_3] : memref<8x32xf32, #tpu.memory_space<vmem>>, vector<8x32xf32>
    %c0_4 = arith.constant 0 : index
    %c0_5 = arith.constant 0 : index
    %5 = vector.load %arg6[%c0_4, %c0_5] : memref<8x32xf32, #tpu.memory_space<vmem>>, vector<8x32xf32>
    %c0_6 = arith.constant 0 : index
    %c0_7 = arith.constant 0 : index
    %6 = vector.load %arg7[%c0_6, %c0_7] : memref<8x32xf32, #tpu.memory_space<vmem>>, vector<8x32xf32>
    %c0_8 = arith.constant 0 : index
    %c0_9 = arith.constant 0 : index
    %7 = vector.load %arg8[%c0_8, %c0_9] : memref<8x2xf32, #tpu.memory_space<vmem>>, vector<8x2xf32>
    %c0_10 = arith.constant 0 : index
    %c0_11 = arith.constant 0 : index
    %8 = vector.load %arg9[%c0_10, %c0_11] : memref<8x2xf32, #tpu.memory_space<vmem>>, vector<8x2xf32>
    %c0_i32_12 = arith.constant 0 : i32
    %cst = arith.constant 0.000000e+00 : f32
    %9 = vector.broadcast %cst : f32 to vector<8x32xf32>
    %10 = arith.subf %9, %5 : vector<8x32xf32>
    %11 = arith.addf %10, %6 : vector<8x32xf32>
    %cst_13 = arith.constant 1.000000e-01 : f32
    %12 = vector.broadcast %cst_13 : f32 to vector<8x32xf32>
    %13 = arith.mulf %12, %11 : vector<8x32xf32>
    %14 = arith.addf %5, %13 : vector<8x32xf32>
    %cst_14 = arith.constant -2.000000e-01 : f32
    %15 = vector.broadcast %cst_14 : f32 to vector<8x32xf32>
    %16 = arith.mulf %15, %6 : vector<8x32xf32>
    %17 = arith.addf %6, %16 : vector<8x32xf32>
    %cst_15 = arith.constant 1.000000e+00 : f32
    %18 = vector.broadcast %cst_15 : f32 to vector<8x32xf32>
    %19 = arith.cmpf ogt, %14, %18 : vector<8x32xf32>
    %20 = arith.extui %19 : vector<8x32xi1> to vector<8x32xi32>
    %21 = arith.sitofp %20 : vector<8x32xi32> to vector<8x32xf32>
    %cst_16 = arith.constant 1.000000e+00 : f32
    %22 = vector.broadcast %cst_16 : f32 to vector<8x32xf32>
    %23 = arith.subf %22, %21 : vector<8x32xf32>
    %24 = arith.mulf %23, %14 : vector<8x32xf32>
    %cst_17 = arith.constant 0.000000e+00 : f32
    %25 = vector.broadcast %cst_17 : f32 to vector<8x32xf32>
    %26 = arith.mulf %21, %25 : vector<8x32xf32>
    %27 = arith.addf %24, %26 : vector<8x32xf32>
    %cst_18 = arith.constant dense<0.000000e+00> : vector<8x34xf32>
    %28 = tpu.matmul %21, %3, %cst_18 {dimension_numbers = #tpu.dot_dimension_numbers<[1], [0], [0], [1], [0, 0, 1, 1], [], []>} : vector<8x32xf32>, vector<32x34xf32>, vector<8x34xf32> -> vector<8x34xf32>
    %29 = vector.extract_strided_slice %28 {offsets = [0, 0], sizes = [8, 32], strides = [1, 1]} : vector<8x34xf32> to vector<8x32xf32>
    %30 = vector.extract_strided_slice %28 {offsets = [0, 32], sizes = [8, 2], strides = [1, 1]} : vector<8x34xf32> to vector<8x2xf32>
    %31 = arith.index_cast %c0_i32_12 : i32 to index
    %c0_19 = arith.constant 0 : index
    %c0_20 = arith.constant 0 : index
    %32 = vector.load %arg1[%31, %c0_19, %c0_20] : memref<8x8x32xf32, #tpu.memory_space<vmem>>, vector<1x8x32xf32>
    %33 = vector.shape_cast %32 : vector<1x8x32xf32> to vector<8x32xf32>
    %34 = arith.addf %17, %33 : vector<8x32xf32>
    %35 = arith.addf %34, %29 : vector<8x32xf32>
    %cst_21 = arith.constant 0.000000e+00 : f32
    %36 = vector.broadcast %cst_21 : f32 to vector<8x2xf32>
    %37 = arith.subf %36, %7 : vector<8x2xf32>
    %38 = arith.addf %37, %8 : vector<8x2xf32>
    %cst_22 = arith.constant 1.000000e-01 : f32
    %39 = vector.broadcast %cst_22 : f32 to vector<8x2xf32>
    %40 = arith.mulf %39, %38 : vector<8x2xf32>
    %41 = arith.addf %7, %40 : vector<8x2xf32>
    %cst_23 = arith.constant -2.000000e-01 : f32
    %42 = vector.broadcast %cst_23 : f32 to vector<8x2xf32>
    %43 = arith.mulf %42, %8 : vector<8x2xf32>
    %44 = arith.addf %8, %43 : vector<8x2xf32>
    %45 = arith.addf %44, %30 : vector<8x2xf32>
    %46 = arith.index_cast %c0_i32_12 : i32 to index
    %c0_24 = arith.constant 0 : index
    %c0_25 = arith.constant 0 : index
    %c0_26 = arith.constant 0 : index
    %47 = vector.load %arg3[%46, %c0_24, %c0_25, %c0_26] : memref<8x3x8x32xf32, #tpu.memory_space<vmem>>, vector<1x1x8x32xf32>
    %48 = vector.shape_cast %47 : vector<1x1x8x32xf32> to vector<8x32xf32>
    %49 = vector.shape_cast %21 : vector<8x32xf32> to vector<1x1x8x32xf32>
    tpu.vector_store %arg3[%46, %c0_24, %c0_25, %c0_26], %49 {strides = array<i32>} : memref<8x3x8x32xf32, #tpu.memory_space<vmem>>, vector<1x1x8x32xf32>,
    %50 = arith.index_cast %c0_i32_12 : i32 to index
    %c1 = arith.constant 1 : index
    %c0_27 = arith.constant 0 : index
    %c0_28 = arith.constant 0 : index
    %51 = vector.load %arg3[%50, %c1, %c0_27, %c0_28] : memref<8x3x8x32xf32, #tpu.memory_space<vmem>>, vector<1x1x8x32xf32>
    %52 = vector.shape_cast %51 : vector<1x1x8x32xf32> to vector<8x32xf32>
    %53 = vector.shape_cast %27 : vector<8x32xf32> to vector<1x1x8x32xf32>
    tpu.vector_store %arg3[%50, %c1, %c0_27, %c0_28], %53 {strides = array<i32>} : memref<8x3x8x32xf32, #tpu.memory_space<vmem>>, vector<1x1x8x32xf32>,
    %54 = arith.index_cast %c0_i32_12 : i32 to index
    %c2 = arith.constant 2 : index
    %c0_29 = arith.constant 0 : index
    %c0_30 = arith.constant 0 : index
    %55 = vector.load %arg3[%54, %c2, %c0_29, %c0_30] : memref<8x3x8x32xf32, #tpu.memory_space<vmem>>, vector<1x1x8x32xf32>
    %56 = vector.shape_cast %55 : vector<1x1x8x32xf32> to vector<8x32xf32>
    %57 = vector.shape_cast %35 : vector<8x32xf32> to vector<1x1x8x32xf32>
    tpu.vector_store %arg3[%54, %c2, %c0_29, %c0_30], %57 {strides = array<i32>} : memref<8x3x8x32xf32, #tpu.memory_space<vmem>>, vector<1x1x8x32xf32>,
    %58 = arith.index_cast %c0_i32_12 : i32 to index
    %c0_31 = arith.constant 0 : index
    %c0_32 = arith.constant 0 : index
    %c0_33 = arith.constant 0 : index
    %59 = vector.load %arg4[%58, %c0_31, %c0_32, %c0_33] : memref<8x2x8x2xf32, #tpu.memory_space<vmem>>, vector<1x1x8x2xf32>
    %60 = vector.shape_cast %59 : vector<1x1x8x2xf32> to vector<8x2xf32>
    %61 = vector.shape_cast %41 : vector<8x2xf32> to vector<1x1x8x2xf32>
    tpu.vector_store %arg4[%58, %c0_31, %c0_32, %c0_33], %61 {strides = array<i32>} : memref<8x2x8x2xf32, #tpu.memory_space<vmem>>, vector<1x1x8x2xf32>,
    %62 = arith.index_cast %c0_i32_12 : i32 to index
    %c1_34 = arith.constant 1 : index
    %c0_35 = arith.constant 0 : index
    %c0_36 = arith.constant 0 : index
    %63 = vector.load %arg4[%62, %c1_34, %c0_35, %c0_36] : memref<8x2x8x2xf32, #tpu.memory_space<vmem>>, vector<1x1x8x2xf32>
    %64 = vector.shape_cast %63 : vector<1x1x8x2xf32> to vector<8x2xf32>
    %65 = vector.shape_cast %45 : vector<8x2xf32> to vector<1x1x8x2xf32>
    tpu.vector_store %arg4[%62, %c1_34, %c0_35, %c0_36], %65 {strides = array<i32>} : memref<8x2x8x2xf32, #tpu.memory_space<vmem>>, vector<1x1x8x2xf32>,
    %c1_i32 = arith.constant 1 : i32
    %cst_37 = arith.constant 0.000000e+00 : f32
    %66 = vector.broadcast %cst_37 : f32 to vector<8x32xf32>
    %67 = arith.subf %66, %27 : vector<8x32xf32>
    %68 = arith.addf %67, %35 : vector<8x32xf32>
    %cst_38 = arith.constant 1.000000e-01 : f32
    %69 = vector.broadcast %cst_38 : f32 to vector<8x32xf32>
    %70 = arith.mulf %69, %68 : vector<8x32xf32>
    %71 = arith.addf %27, %70 : vector<8x32xf32>
    %cst_39 = arith.constant -2.000000e-01 : f32
    %72 = vector.broadcast %cst_39 : f32 to vector<8x32xf32>
    %73 = arith.mulf %72, %35 : vector<8x32xf32>
    %74 = arith.addf %35, %73 : vector<8x32xf32>
    %cst_40 = arith.constant 1.000000e+00 : f32
    %75 = vector.broadcast %cst_40 : f32 to vector<8x32xf32>
    %76 = arith.cmpf ogt, %71, %75 : vector<8x32xf32>
    %77 = arith.extui %76 : vector<8x32xi1> to vector<8x32xi32>
    %78 = arith.sitofp %77 : vector<8x32xi32> to vector<8x32xf32>
    %cst_41 = arith.constant 1.000000e+00 : f32
    %79 = vector.broadcast %cst_41 : f32 to vector<8x32xf32>
    %80 = arith.subf %79, %78 : vector<8x32xf32>
    %81 = arith.mulf %80, %71 : vector<8x32xf32>
    %cst_42 = arith.constant 0.000000e+00 : f32
    %82 = vector.broadcast %cst_42 : f32 to vector<8x32xf32>
    %83 = arith.mulf %78, %82 : vector<8x32xf32>
    %84 = arith.addf %81, %83 : vector<8x32xf32>
    %cst_43 = arith.constant dense<0.000000e+00> : vector<8x34xf32>
    %85 = tpu.matmul %78, %3, %cst_43 {dimension_numbers = #tpu.dot_dimension_numbers<[1], [0], [0], [1], [0, 0, 1, 1], [], []>} : vector<8x32xf32>, vector<32x34xf32>, vector<8x34xf32> -> vector<8x34xf32>
    %86 = vector.extract_strided_slice %85 {offsets = [0, 0], sizes = [8, 32], strides = [1, 1]} : vector<8x34xf32> to vector<8x32xf32>
    %87 = vector.extract_strided_slice %85 {offsets = [0, 32], sizes = [8, 2], strides = [1, 1]} : vector<8x34xf32> to vector<8x2xf32>
    %88 = arith.index_cast %c1_i32 : i32 to index
    %c0_44 = arith.constant 0 : index
    %c0_45 = arith.constant 0 : index
    %89 = vector.load %arg1[%88, %c0_44, %c0_45] : memref<8x8x32xf32, #tpu.memory_space<vmem>>, vector<1x8x32xf32>
    %90 = vector.shape_cast %89 : vector<1x8x32xf32> to vector<8x32xf32>
    %91 = arith.addf %74, %90 : vector<8x32xf32>
    %92 = arith.addf %91, %86 : vector<8x32xf32>
    %cst_46 = arith.constant 0.000000e+00 : f32
    %93 = vector.broadcast %cst_46 : f32 to vector<8x2xf32>
    %94 = arith.subf %93, %41 : vector<8x2xf32>
    %95 = arith.addf %94, %45 : vector<8x2xf32>
    %cst_47 = arith.constant 1.000000e-01 : f32
    %96 = vector.broadcast %cst_47 : f32 to vector<8x2xf32>
    %97 = arith.mulf %96, %95 : vector<8x2xf32>
    %98 = arith.addf %41, %97 : vector<8x2xf32>
    %cst_48 = arith.constant -2.000000e-01 : f32
    %99 = vector.broadcast %cst_48 : f32 to vector<8x2xf32>
    %100 = arith.mulf %99, %45 : vector<8x2xf32>
    %101 = arith.addf %45, %100 : vector<8x2xf32>
    %102 = arith.addf %101, %87 : vector<8x2xf32>
    %103 = arith.index_cast %c1_i32 : i32 to index
    %c0_49 = arith.constant 0 : index
    %c0_50 = arith.constant 0 : index
    %c0_51 = arith.constant 0 : index
    %104 = vector.load %arg3[%103, %c0_49, %c0_50, %c0_51] : memref<8x3x8x32xf32, #tpu.memory_space<vmem>>, vector<1x1x8x32xf32>
    %105 = vector.shape_cast %104 : vector<1x1x8x32xf32> to vector<8x32xf32>
    %106 = vector.shape_cast %78 : vector<8x32xf32> to vector<1x1x8x32xf32>
    tpu.vector_store %arg3[%103, %c0_49, %c0_50, %c0_51], %106 {strides = array<i32>} : memref<8x3x8x32xf32, #tpu.memory_space<vmem>>, vector<1x1x8x32xf32>,
    %107 = arith.index_cast %c1_i32 : i32 to index
    %c1_52 = arith.constant 1 : index
    %c0_53 = arith.constant 0 : index
    %c0_54 = arith.constant 0 : index
    %108 = vector.load %arg3[%107, %c1_52, %c0_53, %c0_54] : memref<8x3x8x32xf32, #tpu.memory_space<vmem>>, vector<1x1x8x32xf32>
    %109 = vector.shape_cast %108 : vector<1x1x8x32xf32> to vector<8x32xf32>
    %110 = vector.shape_cast %84 : vector<8x32xf32> to vector<1x1x8x32xf32>
    tpu.vector_store %arg3[%107, %c1_52, %c0_53, %c0_54], %110 {strides = array<i32>} : memref<8x3x8x32xf32, #tpu.memory_space<vmem>>, vector<1x1x8x32xf32>,
    %111 = arith.index_cast %c1_i32 : i32 to index
    %c2_55 = arith.constant 2 : index
    %c0_56 = arith.constant 0 : index
    %c0_57 = arith.constant 0 : index
    %112 = vector.load %arg3[%111, %c2_55, %c0_56, %c0_57] : memref<8x3x8x32xf32, #tpu.memory_space<vmem>>, vector<1x1x8x32xf32>
    %113 = vector.shape_cast %112 : vector<1x1x8x32xf32> to vector<8x32xf32>
    %114 = vector.shape_cast %92 : vector<8x32xf32> to vector<1x1x8x32xf32>
    tpu.vector_store %arg3[%111, %c2_55, %c0_56, %c0_57], %114 {strides = array<i32>} : memref<8x3x8x32xf32, #tpu.memory_space<vmem>>, vector<1x1x8x32xf32>,
    %115 = arith.index_cast %c1_i32 : i32 to index
    %c0_58 = arith.constant 0 : index
    %c0_59 = arith.constant 0 : index
    %c0_60 = arith.constant 0 : index
    %116 = vector.load %arg4[%115, %c0_58, %c0_59, %c0_60] : memref<8x2x8x2xf32, #tpu.memory_space<vmem>>, vector<1x1x8x2xf32>
    %117 = vector.shape_cast %116 : vector<1x1x8x2xf32> to vector<8x2xf32>
    %118 = vector.shape_cast %98 : vector<8x2xf32> to vector<1x1x8x2xf32>
    tpu.vector_store %arg4[%115, %c0_58, %c0_59, %c0_60], %118 {strides = array<i32>} : memref<8x2x8x2xf32, #tpu.memory_space<vmem>>, vector<1x1x8x2xf32>,
    %119 = arith.index_cast %c1_i32 : i32 to index
    %c1_61 = arith.constant 1 : index
    %c0_62 = arith.constant 0 : index
    %c0_63 = arith.constant 0 : index
    %120 = vector.load %arg4[%119, %c1_61, %c0_62, %c0_63] : memref<8x2x8x2xf32, #tpu.memory_space<vmem>>, vector<1x1x8x2xf32>
    %121 = vector.shape_cast %120 : vector<1x1x8x2xf32> to vector<8x2xf32>
    %122 = vector.shape_cast %102 : vector<8x2xf32> to vector<1x1x8x2xf32>
    tpu.vector_store %arg4[%119, %c1_61, %c0_62, %c0_63], %122 {strides = array<i32>} : memref<8x2x8x2xf32, #tpu.memory_space<vmem>>, vector<1x1x8x2xf32>,
    %c2_i32 = arith.constant 2 : i32
    %cst_64 = arith.constant 0.000000e+00 : f32
    %123 = vector.broadcast %cst_64 : f32 to vector<8x32xf32>
    %124 = arith.subf %123, %84 : vector<8x32xf32>
    %125 = arith.addf %124, %92 : vector<8x32xf32>
    %cst_65 = arith.constant 1.000000e-01 : f32
    %126 = vector.broadcast %cst_65 : f32 to vector<8x32xf32>
    %127 = arith.mulf %126, %125 : vector<8x32xf32>
    %128 = arith.addf %84, %127 : vector<8x32xf32>
    %cst_66 = arith.constant -2.000000e-01 : f32
    %129 = vector.broadcast %cst_66 : f32 to vector<8x32xf32>
    %130 = arith.mulf %129, %92 : vector<8x32xf32>
    %131 = arith.addf %92, %130 : vector<8x32xf32>
    %cst_67 = arith.constant 1.000000e+00 : f32
    %132 = vector.broadcast %cst_67 : f32 to vector<8x32xf32>
    %133 = arith.cmpf ogt, %128, %132 : vector<8x32xf32>
    %134 = arith.extui %133 : vector<8x32xi1> to vector<8x32xi32>
    %135 = arith.sitofp %134 : vector<8x32xi32> to vector<8x32xf32>
    %cst_68 = arith.constant 1.000000e+00 : f32
    %136 = vector.broadcast %cst_68 : f32 to vector<8x32xf32>
    %137 = arith.subf %136, %135 : vector<8x32xf32>
    %138 = arith.mulf %137, %128 : vector<8x32xf32>
    %cst_69 = arith.constant 0.000000e+00 : f32
    %139 = vector.broadcast %cst_69 : f32 to vector<8x32xf32>
    %140 = arith.mulf %135, %139 : vector<8x32xf32>
    %141 = arith.addf %138, %140 : vector<8x32xf32>
    %cst_70 = arith.constant dense<0.000000e+00> : vector<8x34xf32>
    %142 = tpu.matmul %135, %3, %cst_70 {dimension_numbers = #tpu.dot_dimension_numbers<[1], [0], [0], [1], [0, 0, 1, 1], [], []>} : vector<8x32xf32>, vector<32x34xf32>, vector<8x34xf32> -> vector<8x34xf32>
    %143 = vector.extract_strided_slice %142 {offsets = [0, 0], sizes = [8, 32], strides = [1, 1]} : vector<8x34xf32> to vector<8x32xf32>
    %144 = vector.extract_strided_slice %142 {offsets = [0, 32], sizes = [8, 2], strides = [1, 1]} : vector<8x34xf32> to vector<8x2xf32>
    %145 = arith.index_cast %c2_i32 : i32 to index
    %c0_71 = arith.constant 0 : index
    %c0_72 = arith.constant 0 : index
    %146 = vector.load %arg1[%145, %c0_71, %c0_72] : memref<8x8x32xf32, #tpu.memory_space<vmem>>, vector<1x8x32xf32>
    %147 = vector.shape_cast %146 : vector<1x8x32xf32> to vector<8x32xf32>
    %148 = arith.addf %131, %147 : vector<8x32xf32>
    %149 = arith.addf %148, %143 : vector<8x32xf32>
    %cst_73 = arith.constant 0.000000e+00 : f32
    %150 = vector.broadcast %cst_73 : f32 to vector<8x2xf32>
    %151 = arith.subf %150, %98 : vector<8x2xf32>
    %152 = arith.addf %151, %102 : vector<8x2xf32>
    %cst_74 = arith.constant 1.000000e-01 : f32
    %153 = vector.broadcast %cst_74 : f32 to vector<8x2xf32>
    %154 = arith.mulf %153, %152 : vector<8x2xf32>
    %155 = arith.addf %98, %154 : vector<8x2xf32>
    %cst_75 = arith.constant -2.000000e-01 : f32
    %156 = vector.broadcast %cst_75 : f32 to vector<8x2xf32>
    %157 = arith.mulf %156, %102 : vector<8x2xf32>
    %158 = arith.addf %102, %157 : vector<8x2xf32>
    %159 = arith.addf %158, %144 : vector<8x2xf32>
    %160 = arith.index_cast %c2_i32 : i32 to index
    %c0_76 = arith.constant 0 : index
    %c0_77 = arith.constant 0 : index
    %c0_78 = arith.constant 0 : index
    %161 = vector.load %arg3[%160, %c0_76, %c0_77, %c0_78] : memref<8x3x8x32xf32, #tpu.memory_space<vmem>>, vector<1x1x8x32xf32>
    %162 = vector.shape_cast %161 : vector<1x1x8x32xf32> to vector<8x32xf32>
    %163 = vector.shape_cast %135 : vector<8x32xf32> to vector<1x1x8x32xf32>
    tpu.vector_store %arg3[%160, %c0_76, %c0_77, %c0_78], %163 {strides = array<i32>} : memref<8x3x8x32xf32, #tpu.memory_space<vmem>>, vector<1x1x8x32xf32>,
    %164 = arith.index_cast %c2_i32 : i32 to index
    %c1_79 = arith.constant 1 : index
    %c0_80 = arith.constant 0 : index
    %c0_81 = arith.constant 0 : index
    %165 = vector.load %arg3[%164, %c1_79, %c0_80, %c0_81] : memref<8x3x8x32xf32, #tpu.memory_space<vmem>>, vector<1x1x8x32xf32>
    %166 = vector.shape_cast %165 : vector<1x1x8x32xf32> to vector<8x32xf32>
    %167 = vector.shape_cast %141 : vector<8x32xf32> to vector<1x1x8x32xf32>
    tpu.vector_store %arg3[%164, %c1_79, %c0_80, %c0_81], %167 {strides = array<i32>} : memref<8x3x8x32xf32, #tpu.memory_space<vmem>>, vector<1x1x8x32xf32>,
    %168 = arith.index_cast %c2_i32 : i32 to index
    %c2_82 = arith.constant 2 : index
    %c0_83 = arith.constant 0 : index
    %c0_84 = arith.constant 0 : index
    %169 = vector.load %arg3[%168, %c2_82, %c0_83, %c0_84] : memref<8x3x8x32xf32, #tpu.memory_space<vmem>>, vector<1x1x8x32xf32>
    %170 = vector.shape_cast %169 : vector<1x1x8x32xf32> to vector<8x32xf32>
    %171 = vector.shape_cast %149 : vector<8x32xf32> to vector<1x1x8x32xf32>
    tpu.vector_store %arg3[%168, %c2_82, %c0_83, %c0_84], %171 {strides = array<i32>} : memref<8x3x8x32xf32, #tpu.memory_space<vmem>>, vector<1x1x8x32xf32>,
    %172 = arith.index_cast %c2_i32 : i32 to index
    %c0_85 = arith.constant 0 : index
    %c0_86 = arith.constant 0 : index
    %c0_87 = arith.constant 0 : index
    %173 = vector.load %arg4[%172, %c0_85, %c0_86, %c0_87] : memref<8x2x8x2xf32, #tpu.memory_space<vmem>>, vector<1x1x8x2xf32>
    %174 = vector.shape_cast %173 : vector<1x1x8x2xf32> to vector<8x2xf32>
    %175 = vector.shape_cast %155 : vector<8x2xf32> to vector<1x1x8x2xf32>
    tpu.vector_store %arg4[%172, %c0_85, %c0_86, %c0_87], %175 {strides = array<i32>} : memref<8x2x8x2xf32, #tpu.memory_space<vmem>>, vector<1x1x8x2xf32>,
    %176 = arith.index_cast %c2_i32 : i32 to index
    %c1_88 = arith.constant 1 : index
    %c0_89 = arith.constant 0 : index
    %c0_90 = arith.constant 0 : index
    %177 = vector.load %arg4[%176, %c1_88, %c0_89, %c0_90] : memref<8x2x8x2xf32, #tpu.memory_space<vmem>>, vector<1x1x8x2xf32>
    %178 = vector.shape_cast %177 : vector<1x1x8x2xf32> to vector<8x2xf32>
    %179 = vector.shape_cast %159 : vector<8x2xf32> to vector<1x1x8x2xf32>
    tpu.vector_store %arg4[%176, %c1_88, %c0_89, %c0_90], %179 {strides = array<i32>} : memref<8x2x8x2xf32, #tpu.memory_space<vmem>>, vector<1x1x8x2xf32>,
    %c3_i32 = arith.constant 3 : i32
    %cst_91 = arith.constant 0.000000e+00 : f32
    %180 = vector.broadcast %cst_91 : f32 to vector<8x32xf32>
    %181 = arith.subf %180, %141 : vector<8x32xf32>
    %182 = arith.addf %181, %149 : vector<8x32xf32>
    %cst_92 = arith.constant 1.000000e-01 : f32
    %183 = vector.broadcast %cst_92 : f32 to vector<8x32xf32>
    %184 = arith.mulf %183, %182 : vector<8x32xf32>
    %185 = arith.addf %141, %184 : vector<8x32xf32>
    %cst_93 = arith.constant -2.000000e-01 : f32
    %186 = vector.broadcast %cst_93 : f32 to vector<8x32xf32>
    %187 = arith.mulf %186, %149 : vector<8x32xf32>
    %188 = arith.addf %149, %187 : vector<8x32xf32>
    %cst_94 = arith.constant 1.000000e+00 : f32
    %189 = vector.broadcast %cst_94 : f32 to vector<8x32xf32>
    %190 = arith.cmpf ogt, %185, %189 : vector<8x32xf32>
    %191 = arith.extui %190 : vector<8x32xi1> to vector<8x32xi32>
    %192 = arith.sitofp %191 : vector<8x32xi32> to vector<8x32xf32>
    %cst_95 = arith.constant 1.000000e+00 : f32
    %193 = vector.broadcast %cst_95 : f32 to vector<8x32xf32>
    %194 = arith.subf %193, %192 : vector<8x32xf32>
    %195 = arith.mulf %194, %185 : vector<8x32xf32>
    %cst_96 = arith.constant 0.000000e+00 : f32
    %196 = vector.broadcast %cst_96 : f32 to vector<8x32xf32>
    %197 = arith.mulf %192, %196 : vector<8x32xf32>
    %198 = arith.addf %195, %197 : vector<8x32xf32>
    %cst_97 = arith.constant dense<0.000000e+00> : vector<8x34xf32>
    %199 = tpu.matmul %192, %3, %cst_97 {dimension_numbers = #tpu.dot_dimension_numbers<[1], [0], [0], [1], [0, 0, 1, 1], [], []>} : vector<8x32xf32>, vector<32x34xf32>, vector<8x34xf32> -> vector<8x34xf32>
    %200 = vector.extract_strided_slice %199 {offsets = [0, 0], sizes = [8, 32], strides = [1, 1]} : vector<8x34xf32> to vector<8x32xf32>
    %201 = vector.extract_strided_slice %199 {offsets = [0, 32], sizes = [8, 2], strides = [1, 1]} : vector<8x34xf32> to vector<8x2xf32>
    %202 = arith.index_cast %c3_i32 : i32 to index
    %c0_98 = arith.constant 0 : index
    %c0_99 = arith.constant 0 : index
    %203 = vector.load %arg1[%202, %c0_98, %c0_99] : memref<8x8x32xf32, #tpu.memory_space<vmem>>, vector<1x8x32xf32>
    %204 = vector.shape_cast %203 : vector<1x8x32xf32> to vector<8x32xf32>
    %205 = arith.addf %188, %204 : vector<8x32xf32>
    %206 = arith.addf %205, %200 : vector<8x32xf32>
    %cst_100 = arith.constant 0.000000e+00 : f32
    %207 = vector.broadcast %cst_100 : f32 to vector<8x2xf32>
    %208 = arith.subf %207, %155 : vector<8x2xf32>
    %209 = arith.addf %208, %159 : vector<8x2xf32>
    %cst_101 = arith.constant 1.000000e-01 : f32
    %210 = vector.broadcast %cst_101 : f32 to vector<8x2xf32>
    %211 = arith.mulf %210, %209 : vector<8x2xf32>
    %212 = arith.addf %155, %211 : vector<8x2xf32>
    %cst_102 = arith.constant -2.000000e-01 : f32
    %213 = vector.broadcast %cst_102 : f32 to vector<8x2xf32>
    %214 = arith.mulf %213, %159 : vector<8x2xf32>
    %215 = arith.addf %159, %214 : vector<8x2xf32>
    %216 = arith.addf %215, %201 : vector<8x2xf32>
    %217 = arith.index_cast %c3_i32 : i32 to index
    %c0_103 = arith.constant 0 : index
    %c0_104 = arith.constant 0 : index
    %c0_105 = arith.constant 0 : index
    %218 = vector.load %arg3[%217, %c0_103, %c0_104, %c0_105] : memref<8x3x8x32xf32, #tpu.memory_space<vmem>>, vector<1x1x8x32xf32>
    %219 = vector.shape_cast %218 : vector<1x1x8x32xf32> to vector<8x32xf32>
    %220 = vector.shape_cast %192 : vector<8x32xf32> to vector<1x1x8x32xf32>
    tpu.vector_store %arg3[%217, %c0_103, %c0_104, %c0_105], %220 {strides = array<i32>} : memref<8x3x8x32xf32, #tpu.memory_space<vmem>>, vector<1x1x8x32xf32>,
    %221 = arith.index_cast %c3_i32 : i32 to index
    %c1_106 = arith.constant 1 : index
    %c0_107 = arith.constant 0 : index
    %c0_108 = arith.constant 0 : index
    %222 = vector.load %arg3[%221, %c1_106, %c0_107, %c0_108] : memref<8x3x8x32xf32, #tpu.memory_space<vmem>>, vector<1x1x8x32xf32>
    %223 = vector.shape_cast %222 : vector<1x1x8x32xf32> to vector<8x32xf32>
    %224 = vector.shape_cast %198 : vector<8x32xf32> to vector<1x1x8x32xf32>
    tpu.vector_store %arg3[%221, %c1_106, %c0_107, %c0_108], %224 {strides = array<i32>} : memref<8x3x8x32xf32, #tpu.memory_space<vmem>>, vector<1x1x8x32xf32>,
    %225 = arith.index_cast %c3_i32 : i32 to index
    %c2_109 = arith.constant 2 : index
    %c0_110 = arith.constant 0 : index
    %c0_111 = arith.constant 0 : index
    %226 = vector.load %arg3[%225, %c2_109, %c0_110, %c0_111] : memref<8x3x8x32xf32, #tpu.memory_space<vmem>>, vector<1x1x8x32xf32>
    %227 = vector.shape_cast %226 : vector<1x1x8x32xf32> to vector<8x32xf32>
    %228 = vector.shape_cast %206 : vector<8x32xf32> to vector<1x1x8x32xf32>
    tpu.vector_store %arg3[%225, %c2_109, %c0_110, %c0_111], %228 {strides = array<i32>} : memref<8x3x8x32xf32, #tpu.memory_space<vmem>>, vector<1x1x8x32xf32>,
    %229 = arith.index_cast %c3_i32 : i32 to index
    %c0_112 = arith.constant 0 : index
    %c0_113 = arith.constant 0 : index
    %c0_114 = arith.constant 0 : index
    %230 = vector.load %arg4[%229, %c0_112, %c0_113, %c0_114] : memref<8x2x8x2xf32, #tpu.memory_space<vmem>>, vector<1x1x8x2xf32>
    %231 = vector.shape_cast %230 : vector<1x1x8x2xf32> to vector<8x2xf32>
    %232 = vector.shape_cast %212 : vector<8x2xf32> to vector<1x1x8x2xf32>
    tpu.vector_store %arg4[%229, %c0_112, %c0_113, %c0_114], %232 {strides = array<i32>} : memref<8x2x8x2xf32, #tpu.memory_space<vmem>>, vector<1x1x8x2xf32>,
    %233 = arith.index_cast %c3_i32 : i32 to index
    %c1_115 = arith.constant 1 : index
    %c0_116 = arith.constant 0 : index
    %c0_117 = arith.constant 0 : index
    %234 = vector.load %arg4[%233, %c1_115, %c0_116, %c0_117] : memref<8x2x8x2xf32, #tpu.memory_space<vmem>>, vector<1x1x8x2xf32>
    %235 = vector.shape_cast %234 : vector<1x1x8x2xf32> to vector<8x2xf32>
    %236 = vector.shape_cast %216 : vector<8x2xf32> to vector<1x1x8x2xf32>
    tpu.vector_store %arg4[%233, %c1_115, %c0_116, %c0_117], %236 {strides = array<i32>} : memref<8x2x8x2xf32, #tpu.memory_space<vmem>>, vector<1x1x8x2xf32>,
    %c4_i32 = arith.constant 4 : i32
    %cst_118 = arith.constant 0.000000e+00 : f32
    %237 = vector.broadcast %cst_118 : f32 to vector<8x32xf32>
    %238 = arith.subf %237, %198 : vector<8x32xf32>
    %239 = arith.addf %238, %206 : vector<8x32xf32>
    %cst_119 = arith.constant 1.000000e-01 : f32
    %240 = vector.broadcast %cst_119 : f32 to vector<8x32xf32>
    %241 = arith.mulf %240, %239 : vector<8x32xf32>
    %242 = arith.addf %198, %241 : vector<8x32xf32>
    %cst_120 = arith.constant -2.000000e-01 : f32
    %243 = vector.broadcast %cst_120 : f32 to vector<8x32xf32>
    %244 = arith.mulf %243, %206 : vector<8x32xf32>
    %245 = arith.addf %206, %244 : vector<8x32xf32>
    %cst_121 = arith.constant 1.000000e+00 : f32
    %246 = vector.broadcast %cst_121 : f32 to vector<8x32xf32>
    %247 = arith.cmpf ogt, %242, %246 : vector<8x32xf32>
    %248 = arith.extui %247 : vector<8x32xi1> to vector<8x32xi32>
    %249 = arith.sitofp %248 : vector<8x32xi32> to vector<8x32xf32>
    %cst_122 = arith.constant 1.000000e+00 : f32
    %250 = vector.broadcast %cst_122 : f32 to vector<8x32xf32>
    %251 = arith.subf %250, %249 : vector<8x32xf32>
    %252 = arith.mulf %251, %242 : vector<8x32xf32>
    %cst_123 = arith.constant 0.000000e+00 : f32
    %253 = vector.broadcast %cst_123 : f32 to vector<8x32xf32>
    %254 = arith.mulf %249, %253 : vector<8x32xf32>
    %255 = arith.addf %252, %254 : vector<8x32xf32>
    %cst_124 = arith.constant dense<0.000000e+00> : vector<8x34xf32>
    %256 = tpu.matmul %249, %3, %cst_124 {dimension_numbers = #tpu.dot_dimension_numbers<[1], [0], [0], [1], [0, 0, 1, 1], [], []>} : vector<8x32xf32>, vector<32x34xf32>, vector<8x34xf32> -> vector<8x34xf32>
    %257 = vector.extract_strided_slice %256 {offsets = [0, 0], sizes = [8, 32], strides = [1, 1]} : vector<8x34xf32> to vector<8x32xf32>
    %258 = vector.extract_strided_slice %256 {offsets = [0, 32], sizes = [8, 2], strides = [1, 1]} : vector<8x34xf32> to vector<8x2xf32>
    %259 = arith.index_cast %c4_i32 : i32 to index
    %c0_125 = arith.constant 0 : index
    %c0_126 = arith.constant 0 : index
    %260 = vector.load %arg1[%259, %c0_125, %c0_126] : memref<8x8x32xf32, #tpu.memory_space<vmem>>, vector<1x8x32xf32>
    %261 = vector.shape_cast %260 : vector<1x8x32xf32> to vector<8x32xf32>
    %262 = arith.addf %245, %261 : vector<8x32xf32>
    %263 = arith.addf %262, %257 : vector<8x32xf32>
    %cst_127 = arith.constant 0.000000e+00 : f32
    %264 = vector.broadcast %cst_127 : f32 to vector<8x2xf32>
    %265 = arith.subf %264, %212 : vector<8x2xf32>
    %266 = arith.addf %265, %216 : vector<8x2xf32>
    %cst_128 = arith.constant 1.000000e-01 : f32
    %267 = vector.broadcast %cst_128 : f32 to vector<8x2xf32>
    %268 = arith.mulf %267, %266 : vector<8x2xf32>
    %269 = arith.addf %212, %268 : vector<8x2xf32>
    %cst_129 = arith.constant -2.000000e-01 : f32
    %270 = vector.broadcast %cst_129 : f32 to vector<8x2xf32>
    %271 = arith.mulf %270, %216 : vector<8x2xf32>
    %272 = arith.addf %216, %271 : vector<8x2xf32>
    %273 = arith.addf %272, %258 : vector<8x2xf32>
    %274 = arith.index_cast %c4_i32 : i32 to index
    %c0_130 = arith.constant 0 : index
    %c0_131 = arith.constant 0 : index
    %c0_132 = arith.constant 0 : index
    %275 = vector.load %arg3[%274, %c0_130, %c0_131, %c0_132] : memref<8x3x8x32xf32, #tpu.memory_space<vmem>>, vector<1x1x8x32xf32>
    %276 = vector.shape_cast %275 : vector<1x1x8x32xf32> to vector<8x32xf32>
    %277 = vector.shape_cast %249 : vector<8x32xf32> to vector<1x1x8x32xf32>
    tpu.vector_store %arg3[%274, %c0_130, %c0_131, %c0_132], %277 {strides = array<i32>} : memref<8x3x8x32xf32, #tpu.memory_space<vmem>>, vector<1x1x8x32xf32>,
    %278 = arith.index_cast %c4_i32 : i32 to index
    %c1_133 = arith.constant 1 : index
    %c0_134 = arith.constant 0 : index
    %c0_135 = arith.constant 0 : index
    %279 = vector.load %arg3[%278, %c1_133, %c0_134, %c0_135] : memref<8x3x8x32xf32, #tpu.memory_space<vmem>>, vector<1x1x8x32xf32>
    %280 = vector.shape_cast %279 : vector<1x1x8x32xf32> to vector<8x32xf32>
    %281 = vector.shape_cast %255 : vector<8x32xf32> to vector<1x1x8x32xf32>
    tpu.vector_store %arg3[%278, %c1_133, %c0_134, %c0_135], %281 {strides = array<i32>} : memref<8x3x8x32xf32, #tpu.memory_space<vmem>>, vector<1x1x8x32xf32>,
    %282 = arith.index_cast %c4_i32 : i32 to index
    %c2_136 = arith.constant 2 : index
    %c0_137 = arith.constant 0 : index
    %c0_138 = arith.constant 0 : index
    %283 = vector.load %arg3[%282, %c2_136, %c0_137, %c0_138] : memref<8x3x8x32xf32, #tpu.memory_space<vmem>>, vector<1x1x8x32xf32>
    %284 = vector.shape_cast %283 : vector<1x1x8x32xf32> to vector<8x32xf32>
    %285 = vector.shape_cast %263 : vector<8x32xf32> to vector<1x1x8x32xf32>
    tpu.vector_store %arg3[%282, %c2_136, %c0_137, %c0_138], %285 {strides = array<i32>} : memref<8x3x8x32xf32, #tpu.memory_space<vmem>>, vector<1x1x8x32xf32>,
    %286 = arith.index_cast %c4_i32 : i32 to index
    %c0_139 = arith.constant 0 : index
    %c0_140 = arith.constant 0 : index
    %c0_141 = arith.constant 0 : index
    %287 = vector.load %arg4[%286, %c0_139, %c0_140, %c0_141] : memref<8x2x8x2xf32, #tpu.memory_space<vmem>>, vector<1x1x8x2xf32>
    %288 = vector.shape_cast %287 : vector<1x1x8x2xf32> to vector<8x2xf32>
    %289 = vector.shape_cast %269 : vector<8x2xf32> to vector<1x1x8x2xf32>
    tpu.vector_store %arg4[%286, %c0_139, %c0_140, %c0_141], %289 {strides = array<i32>} : memref<8x2x8x2xf32, #tpu.memory_space<vmem>>, vector<1x1x8x2xf32>,
    %290 = arith.index_cast %c4_i32 : i32 to index
    %c1_142 = arith.constant 1 : index
    %c0_143 = arith.constant 0 : index
    %c0_144 = arith.constant 0 : index
    %291 = vector.load %arg4[%290, %c1_142, %c0_143, %c0_144] : memref<8x2x8x2xf32, #tpu.memory_space<vmem>>, vector<1x1x8x2xf32>
    %292 = vector.shape_cast %291 : vector<1x1x8x2xf32> to vector<8x2xf32>
    %293 = vector.shape_cast %273 : vector<8x2xf32> to vector<1x1x8x2xf32>
    tpu.vector_store %arg4[%290, %c1_142, %c0_143, %c0_144], %293 {strides = array<i32>} : memref<8x2x8x2xf32, #tpu.memory_space<vmem>>, vector<1x1x8x2xf32>,
    %c5_i32 = arith.constant 5 : i32
    %cst_145 = arith.constant 0.000000e+00 : f32
    %294 = vector.broadcast %cst_145 : f32 to vector<8x32xf32>
    %295 = arith.subf %294, %255 : vector<8x32xf32>
    %296 = arith.addf %295, %263 : vector<8x32xf32>
    %cst_146 = arith.constant 1.000000e-01 : f32
    %297 = vector.broadcast %cst_146 : f32 to vector<8x32xf32>
    %298 = arith.mulf %297, %296 : vector<8x32xf32>
    %299 = arith.addf %255, %298 : vector<8x32xf32>
    %cst_147 = arith.constant -2.000000e-01 : f32
    %300 = vector.broadcast %cst_147 : f32 to vector<8x32xf32>
    %301 = arith.mulf %300, %263 : vector<8x32xf32>
    %302 = arith.addf %263, %301 : vector<8x32xf32>
    %cst_148 = arith.constant 1.000000e+00 : f32
    %303 = vector.broadcast %cst_148 : f32 to vector<8x32xf32>
    %304 = arith.cmpf ogt, %299, %303 : vector<8x32xf32>
    %305 = arith.extui %304 : vector<8x32xi1> to vector<8x32xi32>
    %306 = arith.sitofp %305 : vector<8x32xi32> to vector<8x32xf32>
    %cst_149 = arith.constant 1.000000e+00 : f32
    %307 = vector.broadcast %cst_149 : f32 to vector<8x32xf32>
    %308 = arith.subf %307, %306 : vector<8x32xf32>
    %309 = arith.mulf %308, %299 : vector<8x32xf32>
    %cst_150 = arith.constant 0.000000e+00 : f32
    %310 = vector.broadcast %cst_150 : f32 to vector<8x32xf32>
    %311 = arith.mulf %306, %310 : vector<8x32xf32>
    %312 = arith.addf %309, %311 : vector<8x32xf32>
    %cst_151 = arith.constant dense<0.000000e+00> : vector<8x34xf32>
    %313 = tpu.matmul %306, %3, %cst_151 {dimension_numbers = #tpu.dot_dimension_numbers<[1], [0], [0], [1], [0, 0, 1, 1], [], []>} : vector<8x32xf32>, vector<32x34xf32>, vector<8x34xf32> -> vector<8x34xf32>
    %314 = vector.extract_strided_slice %313 {offsets = [0, 0], sizes = [8, 32], strides = [1, 1]} : vector<8x34xf32> to vector<8x32xf32>
    %315 = vector.extract_strided_slice %313 {offsets = [0, 32], sizes = [8, 2], strides = [1, 1]} : vector<8x34xf32> to vector<8x2xf32>
    %316 = arith.index_cast %c5_i32 : i32 to index
    %c0_152 = arith.constant 0 : index
    %c0_153 = arith.constant 0 : index
    %317 = vector.load %arg1[%316, %c0_152, %c0_153] : memref<8x8x32xf32, #tpu.memory_space<vmem>>, vector<1x8x32xf32>
    %318 = vector.shape_cast %317 : vector<1x8x32xf32> to vector<8x32xf32>
    %319 = arith.addf %302, %318 : vector<8x32xf32>
    %320 = arith.addf %319, %314 : vector<8x32xf32>
    %cst_154 = arith.constant 0.000000e+00 : f32
    %321 = vector.broadcast %cst_154 : f32 to vector<8x2xf32>
    %322 = arith.subf %321, %269 : vector<8x2xf32>
    %323 = arith.addf %322, %273 : vector<8x2xf32>
    %cst_155 = arith.constant 1.000000e-01 : f32
    %324 = vector.broadcast %cst_155 : f32 to vector<8x2xf32>
    %325 = arith.mulf %324, %323 : vector<8x2xf32>
    %326 = arith.addf %269, %325 : vector<8x2xf32>
    %cst_156 = arith.constant -2.000000e-01 : f32
    %327 = vector.broadcast %cst_156 : f32 to vector<8x2xf32>
    %328 = arith.mulf %327, %273 : vector<8x2xf32>
    %329 = arith.addf %273, %328 : vector<8x2xf32>
    %330 = arith.addf %329, %315 : vector<8x2xf32>
    %331 = arith.index_cast %c5_i32 : i32 to index
    %c0_157 = arith.constant 0 : index
    %c0_158 = arith.constant 0 : index
    %c0_159 = arith.constant 0 : index
    %332 = vector.load %arg3[%331, %c0_157, %c0_158, %c0_159] : memref<8x3x8x32xf32, #tpu.memory_space<vmem>>, vector<1x1x8x32xf32>
    %333 = vector.shape_cast %332 : vector<1x1x8x32xf32> to vector<8x32xf32>
    %334 = vector.shape_cast %306 : vector<8x32xf32> to vector<1x1x8x32xf32>
    tpu.vector_store %arg3[%331, %c0_157, %c0_158, %c0_159], %334 {strides = array<i32>} : memref<8x3x8x32xf32, #tpu.memory_space<vmem>>, vector<1x1x8x32xf32>,
    %335 = arith.index_cast %c5_i32 : i32 to index
    %c1_160 = arith.constant 1 : index
    %c0_161 = arith.constant 0 : index
    %c0_162 = arith.constant 0 : index
    %336 = vector.load %arg3[%335, %c1_160, %c0_161, %c0_162] : memref<8x3x8x32xf32, #tpu.memory_space<vmem>>, vector<1x1x8x32xf32>
    %337 = vector.shape_cast %336 : vector<1x1x8x32xf32> to vector<8x32xf32>
    %338 = vector.shape_cast %312 : vector<8x32xf32> to vector<1x1x8x32xf32>
    tpu.vector_store %arg3[%335, %c1_160, %c0_161, %c0_162], %338 {strides = array<i32>} : memref<8x3x8x32xf32, #tpu.memory_space<vmem>>, vector<1x1x8x32xf32>,
    %339 = arith.index_cast %c5_i32 : i32 to index
    %c2_163 = arith.constant 2 : index
    %c0_164 = arith.constant 0 : index
    %c0_165 = arith.constant 0 : index
    %340 = vector.load %arg3[%339, %c2_163, %c0_164, %c0_165] : memref<8x3x8x32xf32, #tpu.memory_space<vmem>>, vector<1x1x8x32xf32>
    %341 = vector.shape_cast %340 : vector<1x1x8x32xf32> to vector<8x32xf32>
    %342 = vector.shape_cast %320 : vector<8x32xf32> to vector<1x1x8x32xf32>
    tpu.vector_store %arg3[%339, %c2_163, %c0_164, %c0_165], %342 {strides = array<i32>} : memref<8x3x8x32xf32, #tpu.memory_space<vmem>>, vector<1x1x8x32xf32>,
    %343 = arith.index_cast %c5_i32 : i32 to index
    %c0_166 = arith.constant 0 : index
    %c0_167 = arith.constant 0 : index
    %c0_168 = arith.constant 0 : index
    %344 = vector.load %arg4[%343, %c0_166, %c0_167, %c0_168] : memref<8x2x8x2xf32, #tpu.memory_space<vmem>>, vector<1x1x8x2xf32>
    %345 = vector.shape_cast %344 : vector<1x1x8x2xf32> to vector<8x2xf32>
    %346 = vector.shape_cast %326 : vector<8x2xf32> to vector<1x1x8x2xf32>
    tpu.vector_store %arg4[%343, %c0_166, %c0_167, %c0_168], %346 {strides = array<i32>} : memref<8x2x8x2xf32, #tpu.memory_space<vmem>>, vector<1x1x8x2xf32>,
    %347 = arith.index_cast %c5_i32 : i32 to index
    %c1_169 = arith.constant 1 : index
    %c0_170 = arith.constant 0 : index
    %c0_171 = arith.constant 0 : index
    %348 = vector.load %arg4[%347, %c1_169, %c0_170, %c0_171] : memref<8x2x8x2xf32, #tpu.memory_space<vmem>>, vector<1x1x8x2xf32>
    %349 = vector.shape_cast %348 : vector<1x1x8x2xf32> to vector<8x2xf32>
    %350 = vector.shape_cast %330 : vector<8x2xf32> to vector<1x1x8x2xf32>
    tpu.vector_store %arg4[%347, %c1_169, %c0_170, %c0_171], %350 {strides = array<i32>} : memref<8x2x8x2xf32, #tpu.memory_space<vmem>>, vector<1x1x8x2xf32>,
    %c6_i32 = arith.constant 6 : i32
    %cst_172 = arith.constant 0.000000e+00 : f32
    %351 = vector.broadcast %cst_172 : f32 to vector<8x32xf32>
    %352 = arith.subf %351, %312 : vector<8x32xf32>
    %353 = arith.addf %352, %320 : vector<8x32xf32>
    %cst_173 = arith.constant 1.000000e-01 : f32
    %354 = vector.broadcast %cst_173 : f32 to vector<8x32xf32>
    %355 = arith.mulf %354, %353 : vector<8x32xf32>
    %356 = arith.addf %312, %355 : vector<8x32xf32>
    %cst_174 = arith.constant -2.000000e-01 : f32
    %357 = vector.broadcast %cst_174 : f32 to vector<8x32xf32>
    %358 = arith.mulf %357, %320 : vector<8x32xf32>
    %359 = arith.addf %320, %358 : vector<8x32xf32>
    %cst_175 = arith.constant 1.000000e+00 : f32
    %360 = vector.broadcast %cst_175 : f32 to vector<8x32xf32>
    %361 = arith.cmpf ogt, %356, %360 : vector<8x32xf32>
    %362 = arith.extui %361 : vector<8x32xi1> to vector<8x32xi32>
    %363 = arith.sitofp %362 : vector<8x32xi32> to vector<8x32xf32>
    %cst_176 = arith.constant 1.000000e+00 : f32
    %364 = vector.broadcast %cst_176 : f32 to vector<8x32xf32>
    %365 = arith.subf %364, %363 : vector<8x32xf32>
    %366 = arith.mulf %365, %356 : vector<8x32xf32>
    %cst_177 = arith.constant 0.000000e+00 : f32
    %367 = vector.broadcast %cst_177 : f32 to vector<8x32xf32>
    %368 = arith.mulf %363, %367 : vector<8x32xf32>
    %369 = arith.addf %366, %368 : vector<8x32xf32>
    %cst_178 = arith.constant dense<0.000000e+00> : vector<8x34xf32>
    %370 = tpu.matmul %363, %3, %cst_178 {dimension_numbers = #tpu.dot_dimension_numbers<[1], [0], [0], [1], [0, 0, 1, 1], [], []>} : vector<8x32xf32>, vector<32x34xf32>, vector<8x34xf32> -> vector<8x34xf32>
    %371 = vector.extract_strided_slice %370 {offsets = [0, 0], sizes = [8, 32], strides = [1, 1]} : vector<8x34xf32> to vector<8x32xf32>
    %372 = vector.extract_strided_slice %370 {offsets = [0, 32], sizes = [8, 2], strides = [1, 1]} : vector<8x34xf32> to vector<8x2xf32>
    %373 = arith.index_cast %c6_i32 : i32 to index
    %c0_179 = arith.constant 0 : index
    %c0_180 = arith.constant 0 : index
    %374 = vector.load %arg1[%373, %c0_179, %c0_180] : memref<8x8x32xf32, #tpu.memory_space<vmem>>, vector<1x8x32xf32>
    %375 = vector.shape_cast %374 : vector<1x8x32xf32> to vector<8x32xf32>
    %376 = arith.addf %359, %375 : vector<8x32xf32>
    %377 = arith.addf %376, %371 : vector<8x32xf32>
    %cst_181 = arith.constant 0.000000e+00 : f32
    %378 = vector.broadcast %cst_181 : f32 to vector<8x2xf32>
    %379 = arith.subf %378, %326 : vector<8x2xf32>
    %380 = arith.addf %379, %330 : vector<8x2xf32>
    %cst_182 = arith.constant 1.000000e-01 : f32
    %381 = vector.broadcast %cst_182 : f32 to vector<8x2xf32>
    %382 = arith.mulf %381, %380 : vector<8x2xf32>
    %383 = arith.addf %326, %382 : vector<8x2xf32>
    %cst_183 = arith.constant -2.000000e-01 : f32
    %384 = vector.broadcast %cst_183 : f32 to vector<8x2xf32>
    %385 = arith.mulf %384, %330 : vector<8x2xf32>
    %386 = arith.addf %330, %385 : vector<8x2xf32>
    %387 = arith.addf %386, %372 : vector<8x2xf32>
    %388 = arith.index_cast %c6_i32 : i32 to index
    %c0_184 = arith.constant 0 : index
    %c0_185 = arith.constant 0 : index
    %c0_186 = arith.constant 0 : index
    %389 = vector.load %arg3[%388, %c0_184, %c0_185, %c0_186] : memref<8x3x8x32xf32, #tpu.memory_space<vmem>>, vector<1x1x8x32xf32>
    %390 = vector.shape_cast %389 : vector<1x1x8x32xf32> to vector<8x32xf32>
    %391 = vector.shape_cast %363 : vector<8x32xf32> to vector<1x1x8x32xf32>
    tpu.vector_store %arg3[%388, %c0_184, %c0_185, %c0_186], %391 {strides = array<i32>} : memref<8x3x8x32xf32, #tpu.memory_space<vmem>>, vector<1x1x8x32xf32>,
    %392 = arith.index_cast %c6_i32 : i32 to index
    %c1_187 = arith.constant 1 : index
    %c0_188 = arith.constant 0 : index
    %c0_189 = arith.constant 0 : index
    %393 = vector.load %arg3[%392, %c1_187, %c0_188, %c0_189] : memref<8x3x8x32xf32, #tpu.memory_space<vmem>>, vector<1x1x8x32xf32>
    %394 = vector.shape_cast %393 : vector<1x1x8x32xf32> to vector<8x32xf32>
    %395 = vector.shape_cast %369 : vector<8x32xf32> to vector<1x1x8x32xf32>
    tpu.vector_store %arg3[%392, %c1_187, %c0_188, %c0_189], %395 {strides = array<i32>} : memref<8x3x8x32xf32, #tpu.memory_space<vmem>>, vector<1x1x8x32xf32>,
    %396 = arith.index_cast %c6_i32 : i32 to index
    %c2_190 = arith.constant 2 : index
    %c0_191 = arith.constant 0 : index
    %c0_192 = arith.constant 0 : index
    %397 = vector.load %arg3[%396, %c2_190, %c0_191, %c0_192] : memref<8x3x8x32xf32, #tpu.memory_space<vmem>>, vector<1x1x8x32xf32>
    %398 = vector.shape_cast %397 : vector<1x1x8x32xf32> to vector<8x32xf32>
    %399 = vector.shape_cast %377 : vector<8x32xf32> to vector<1x1x8x32xf32>
    tpu.vector_store %arg3[%396, %c2_190, %c0_191, %c0_192], %399 {strides = array<i32>} : memref<8x3x8x32xf32, #tpu.memory_space<vmem>>, vector<1x1x8x32xf32>,
    %400 = arith.index_cast %c6_i32 : i32 to index
    %c0_193 = arith.constant 0 : index
    %c0_194 = arith.constant 0 : index
    %c0_195 = arith.constant 0 : index
    %401 = vector.load %arg4[%400, %c0_193, %c0_194, %c0_195] : memref<8x2x8x2xf32, #tpu.memory_space<vmem>>, vector<1x1x8x2xf32>
    %402 = vector.shape_cast %401 : vector<1x1x8x2xf32> to vector<8x2xf32>
    %403 = vector.shape_cast %383 : vector<8x2xf32> to vector<1x1x8x2xf32>
    tpu.vector_store %arg4[%400, %c0_193, %c0_194, %c0_195], %403 {strides = array<i32>} : memref<8x2x8x2xf32, #tpu.memory_space<vmem>>, vector<1x1x8x2xf32>,
    %404 = arith.index_cast %c6_i32 : i32 to index
    %c1_196 = arith.constant 1 : index
    %c0_197 = arith.constant 0 : index
    %c0_198 = arith.constant 0 : index
    %405 = vector.load %arg4[%404, %c1_196, %c0_197, %c0_198] : memref<8x2x8x2xf32, #tpu.memory_space<vmem>>, vector<1x1x8x2xf32>
    %406 = vector.shape_cast %405 : vector<1x1x8x2xf32> to vector<8x2xf32>
    %407 = vector.shape_cast %387 : vector<8x2xf32> to vector<1x1x8x2xf32>
    tpu.vector_store %arg4[%404, %c1_196, %c0_197, %c0_198], %407 {strides = array<i32>} : memref<8x2x8x2xf32, #tpu.memory_space<vmem>>, vector<1x1x8x2xf32>,
    %c7_i32 = arith.constant 7 : i32
    %cst_199 = arith.constant 0.000000e+00 : f32
    %408 = vector.broadcast %cst_199 : f32 to vector<8x32xf32>
    %409 = arith.subf %408, %369 : vector<8x32xf32>
    %410 = arith.addf %409, %377 : vector<8x32xf32>
    %cst_200 = arith.constant 1.000000e-01 : f32
    %411 = vector.broadcast %cst_200 : f32 to vector<8x32xf32>
    %412 = arith.mulf %411, %410 : vector<8x32xf32>
    %413 = arith.addf %369, %412 : vector<8x32xf32>
    %cst_201 = arith.constant -2.000000e-01 : f32
    %414 = vector.broadcast %cst_201 : f32 to vector<8x32xf32>
    %415 = arith.mulf %414, %377 : vector<8x32xf32>
    %416 = arith.addf %377, %415 : vector<8x32xf32>
    %cst_202 = arith.constant 1.000000e+00 : f32
    %417 = vector.broadcast %cst_202 : f32 to vector<8x32xf32>
    %418 = arith.cmpf ogt, %413, %417 : vector<8x32xf32>
    %419 = arith.extui %418 : vector<8x32xi1> to vector<8x32xi32>
    %420 = arith.sitofp %419 : vector<8x32xi32> to vector<8x32xf32>
    %cst_203 = arith.constant 1.000000e+00 : f32
    %421 = vector.broadcast %cst_203 : f32 to vector<8x32xf32>
    %422 = arith.subf %421, %420 : vector<8x32xf32>
    %423 = arith.mulf %422, %413 : vector<8x32xf32>
    %cst_204 = arith.constant 0.000000e+00 : f32
    %424 = vector.broadcast %cst_204 : f32 to vector<8x32xf32>
    %425 = arith.mulf %420, %424 : vector<8x32xf32>
    %426 = arith.addf %423, %425 : vector<8x32xf32>
    %cst_205 = arith.constant dense<0.000000e+00> : vector<8x34xf32>
    %427 = tpu.matmul %420, %3, %cst_205 {dimension_numbers = #tpu.dot_dimension_numbers<[1], [0], [0], [1], [0, 0, 1, 1], [], []>} : vector<8x32xf32>, vector<32x34xf32>, vector<8x34xf32> -> vector<8x34xf32>
    %428 = vector.extract_strided_slice %427 {offsets = [0, 0], sizes = [8, 32], strides = [1, 1]} : vector<8x34xf32> to vector<8x32xf32>
    %429 = vector.extract_strided_slice %427 {offsets = [0, 32], sizes = [8, 2], strides = [1, 1]} : vector<8x34xf32> to vector<8x2xf32>
    %430 = arith.index_cast %c7_i32 : i32 to index
    %c0_206 = arith.constant 0 : index
    %c0_207 = arith.constant 0 : index
    %431 = vector.load %arg1[%430, %c0_206, %c0_207] : memref<8x8x32xf32, #tpu.memory_space<vmem>>, vector<1x8x32xf32>
    %432 = vector.shape_cast %431 : vector<1x8x32xf32> to vector<8x32xf32>
    %433 = arith.addf %416, %432 : vector<8x32xf32>
    %434 = arith.addf %433, %428 : vector<8x32xf32>
    %cst_208 = arith.constant 0.000000e+00 : f32
    %435 = vector.broadcast %cst_208 : f32 to vector<8x2xf32>
    %436 = arith.subf %435, %383 : vector<8x2xf32>
    %437 = arith.addf %436, %387 : vector<8x2xf32>
    %cst_209 = arith.constant 1.000000e-01 : f32
    %438 = vector.broadcast %cst_209 : f32 to vector<8x2xf32>
    %439 = arith.mulf %438, %437 : vector<8x2xf32>
    %440 = arith.addf %383, %439 : vector<8x2xf32>
    %cst_210 = arith.constant -2.000000e-01 : f32
    %441 = vector.broadcast %cst_210 : f32 to vector<8x2xf32>
    %442 = arith.mulf %441, %387 : vector<8x2xf32>
    %443 = arith.addf %387, %442 : vector<8x2xf32>
    %444 = arith.addf %443, %429 : vector<8x2xf32>
    %445 = arith.index_cast %c7_i32 : i32 to index
    %c0_211 = arith.constant 0 : index
    %c0_212 = arith.constant 0 : index
    %c0_213 = arith.constant 0 : index
    %446 = vector.load %arg3[%445, %c0_211, %c0_212, %c0_213] : memref<8x3x8x32xf32, #tpu.memory_space<vmem>>, vector<1x1x8x32xf32>
    %447 = vector.shape_cast %446 : vector<1x1x8x32xf32> to vector<8x32xf32>
    %448 = vector.shape_cast %420 : vector<8x32xf32> to vector<1x1x8x32xf32>
    tpu.vector_store %arg3[%445, %c0_211, %c0_212, %c0_213], %448 {strides = array<i32>} : memref<8x3x8x32xf32, #tpu.memory_space<vmem>>, vector<1x1x8x32xf32>,
    %449 = arith.index_cast %c7_i32 : i32 to index
    %c1_214 = arith.constant 1 : index
    %c0_215 = arith.constant 0 : index
    %c0_216 = arith.constant 0 : index
    %450 = vector.load %arg3[%449, %c1_214, %c0_215, %c0_216] : memref<8x3x8x32xf32, #tpu.memory_space<vmem>>, vector<1x1x8x32xf32>
    %451 = vector.shape_cast %450 : vector<1x1x8x32xf32> to vector<8x32xf32>
    %452 = vector.shape_cast %426 : vector<8x32xf32> to vector<1x1x8x32xf32>
    tpu.vector_store %arg3[%449, %c1_214, %c0_215, %c0_216], %452 {strides = array<i32>} : memref<8x3x8x32xf32, #tpu.memory_space<vmem>>, vector<1x1x8x32xf32>,
    %453 = arith.index_cast %c7_i32 : i32 to index
    %c2_217 = arith.constant 2 : index
    %c0_218 = arith.constant 0 : index
    %c0_219 = arith.constant 0 : index
    %454 = vector.load %arg3[%453, %c2_217, %c0_218, %c0_219] : memref<8x3x8x32xf32, #tpu.memory_space<vmem>>, vector<1x1x8x32xf32>
    %455 = vector.shape_cast %454 : vector<1x1x8x32xf32> to vector<8x32xf32>
    %456 = vector.shape_cast %434 : vector<8x32xf32> to vector<1x1x8x32xf32>
    tpu.vector_store %arg3[%453, %c2_217, %c0_218, %c0_219], %456 {strides = array<i32>} : memref<8x3x8x32xf32, #tpu.memory_space<vmem>>, vector<1x1x8x32xf32>,
    %457 = arith.index_cast %c7_i32 : i32 to index
    %c0_220 = arith.constant 0 : index
    %c0_221 = arith.constant 0 : index
    %c0_222 = arith.constant 0 : index
    %458 = vector.load %arg4[%457, %c0_220, %c0_221, %c0_222] : memref<8x2x8x2xf32, #tpu.memory_space<vmem>>, vector<1x1x8x2xf32>
    %459 = vector.shape_cast %458 : vector<1x1x8x2xf32> to vector<8x2xf32>
    %460 = vector.shape_cast %440 : vector<8x2xf32> to vector<1x1x8x2xf32>
    tpu.vector_store %arg4[%457, %c0_220, %c0_221, %c0_222], %460 {strides = array<i32>} : memref<8x2x8x2xf32, #tpu.memory_space<vmem>>, vector<1x1x8x2xf32>,
    %461 = arith.index_cast %c7_i32 : i32 to index
    %c1_223 = arith.constant 1 : index
    %c0_224 = arith.constant 0 : index
    %c0_225 = arith.constant 0 : index
    %462 = vector.load %arg4[%461, %c1_223, %c0_224, %c0_225] : memref<8x2x8x2xf32, #tpu.memory_space<vmem>>, vector<1x1x8x2xf32>
    %463 = vector.shape_cast %462 : vector<1x1x8x2xf32> to vector<8x2xf32>
    %464 = vector.shape_cast %444 : vector<8x2xf32> to vector<1x1x8x2xf32>
    tpu.vector_store %arg4[%461, %c1_223, %c0_224, %c0_225], %464 {strides = array<i32>} : memref<8x2x8x2xf32, #tpu.memory_space<vmem>>, vector<1x1x8x2xf32>,
    %c8_i32 = arith.constant 8 : i32
    %c0_226 = arith.constant 0 : index
    %c0_227 = arith.constant 0 : index
    %465 = vector.load %arg5[%c0_226, %c0_227] : memref<8x32xf32, #tpu.memory_space<vmem>>, vector<8x32xf32>
    tpu.vector_store %arg5[%c0_226, %c0_227], %420 {strides = array<i32>} : memref<8x32xf32, #tpu.memory_space<vmem>>, vector<8x32xf32>,
    %c0_228 = arith.constant 0 : index
    %c0_229 = arith.constant 0 : index
    %466 = vector.load %arg6[%c0_228, %c0_229] : memref<8x32xf32, #tpu.memory_space<vmem>>, vector<8x32xf32>
    tpu.vector_store %arg6[%c0_228, %c0_229], %426 {strides = array<i32>} : memref<8x32xf32, #tpu.memory_space<vmem>>, vector<8x32xf32>,
    %c0_230 = arith.constant 0 : index
    %c0_231 = arith.constant 0 : index
    %467 = vector.load %arg7[%c0_230, %c0_231] : memref<8x32xf32, #tpu.memory_space<vmem>>, vector<8x32xf32>
    tpu.vector_store %arg7[%c0_230, %c0_231], %434 {strides = array<i32>} : memref<8x32xf32, #tpu.memory_space<vmem>>, vector<8x32xf32>,
    %c0_232 = arith.constant 0 : index
    %c0_233 = arith.constant 0 : index
    %468 = vector.load %arg8[%c0_232, %c0_233] : memref<8x2xf32, #tpu.memory_space<vmem>>, vector<8x2xf32>
    tpu.vector_store %arg8[%c0_232, %c0_233], %440 {strides = array<i32>} : memref<8x2xf32, #tpu.memory_space<vmem>>, vector<8x2xf32>,
    %c0_234 = arith.constant 0 : index
    %c0_235 = arith.constant 0 : index
    %469 = vector.load %arg9[%c0_234, %c0_235] : memref<8x2xf32, #tpu.memory_space<vmem>>, vector<8x2xf32>
    tpu.vector_store %arg9[%c0_234, %c0_235], %444 {strides = array<i32>} : memref<8x2xf32, #tpu.memory_space<vmem>>, vector<8x2xf32>,
    return
  }
  func.func @transform_0(%arg0: i32) -> (i32, i32, i32) {
    %c0_i32 = arith.constant 0 : i32
    %c0_i32_0 = arith.constant 0 : i32
    %c0_i32_1 = arith.constant 0 : i32
    return %arg0, %c0_i32, %c0_i32_0 : i32, i32, i32
  }
  func.func @transform_1(%arg0: i32) -> (i32, i32) {
    %c0_i32 = arith.constant 0 : i32
    %c0_i32_0 = arith.constant 0 : i32
    %c0_i32_1 = arith.constant 0 : i32
    return %c0_i32, %c0_i32_0 : i32, i32
  }
  func.func @transform_2(%arg0: i32) -> (i32, i32, i32, i32) {
    %c0_i32 = arith.constant 0 : i32
    %c0_i32_0 = arith.constant 0 : i32
    %c0_i32_1 = arith.constant 0 : i32
    %c0_i32_2 = arith.constant 0 : i32
    return %arg0, %c0_i32, %c0_i32_0, %c0_i32_1 : i32, i32, i32, i32
  }
  func.func @transform_3(%arg0: i32) -> (i32, i32, i32, i32) {
    %c0_i32 = arith.constant 0 : i32
    %c0_i32_0 = arith.constant 0 : i32
    %c0_i32_1 = arith.constant 0 : i32
    %c0_i32_2 = arith.constant 0 : i32
    return %arg0, %c0_i32, %c0_i32_0, %c0_i32_1 : i32, i32, i32, i32
  }
}

</mosaic_0001>

<bundles_post_ra>
// kernel: snn_forward.1
= control target key start
LH: loop header
LB: loop body
LE: loop exit
PB: predicated region body
PF: predicated region fallthrough
CT: control target
= control target key end

     0   :  { %vm17_vm0 = vcmask 261120   ;;  %v595_v2 = vmov 0.0   ;;  %vm21_vm2 = vcmask 15360   ;;  %s596_s25 = smov 96   ;;  %s849_s1 = inlined_call_operand.vmem [shape: f32[32,34], index: 1, kind: input, shape index: {}]   ;;  %s850_s2 = inlined_call_operand.vmem [shape: f32[8,3,8,32], index: 2, kind: output, shape index: {0}]   ;;  %s851_s0 = inlined_call_operand.vmem [shape: f32[8,8,32], index: 0, kind: input, shape index: {}]   ;;  %s852_s3 = inlined_call_operand.vmem [shape: f32[8,2,8,2], index: 3, kind: output, shape index: {1}]  }
   0x1   :  { %v27_v0 = vld [vmem:[%s849_s1 + $0x18] sm:$0xff]  ;;  %v26_v1 = vld [vmem:[%s849_s1 + $0x10] sm:$0xff]  ;;  %19 = vst.msk [vmem:[#allocation3] sm:$0xff] %vm17_vm0, %v595_v2  ;;  %v25_v3 = vld [vmem:[%s849_s1 + $0x8] sm:$0xff] }
   0x2   :  { %61 = vmatpush.msra.mxu0 %v27_v0  ;;  %20 = vst.msk [vmem:[#allocation4] sm:$0xff] %vm17_vm0, %v595_v2  ;;  %120 = vmatpush.msra.mxu1 %v27_v0  ;;  %v24_v4 = vld [vmem:[%s849_s1] sm:$0xff]  ;;  %v539_v47 = vld [vmem:[%s851_s0 + $0x8] sm:$0xff] }
   0x3   :  { %181 = vmatpush.msra.mxu2 %v27_v0  ;;  %242 = vmatpush.msra.mxu3 %v27_v0  ;;  %22 = vst.msk [vmem:[#allocation5] sm:$0xff] %vm21_vm2, %v595_v2  ;;  %v69_v19 = vld [vmem:[%s851_s0] sm:$0xff] }
   0x4   :  { %62 = vmatpush.msra.mxu0 %v26_v1  ;;  %121 = vmatpush.msra.mxu1 %v26_v1  ;;  %23 = vst.msk [vmem:[#allocation6] sm:$0xff] %vm21_vm2, %v595_v2 }
   0x5   :  { %182 = vmatpush.msra.mxu2 %v26_v1  ;;  %243 = vmatpush.msra.mxu3 %v26_v1 }
   0x6   :  { %63 = vmatpush.msra.mxu0 %v25_v3  ;;  %122 = vmatpush.msra.mxu1 %v25_v3 }
   0x7   :  { %183 = vmatpush.msra.mxu2 %v25_v3  ;;  %244 = vmatpush.msra.mxu3 %v25_v3 }
   0x8   :  { %64 = vmatpush.msra.mxu0 %v24_v4  ;;  %v28_v5 = vld [vmem:[#allocation3] sm:$0xff]  ;;  %123 = vmatpush.msra.mxu1 %v24_v4 }
   0x9   :  { %v29_v6 = vld [vmem:[#allocation4] sm:$0xff]  ;;  %v32_v7 = vsub.f32 0.0, %v28_v5  ;;  %184 = vmatpush.msra.mxu2 %v24_v4  ;;  %245 = vmatpush.msra.mxu3 %v24_v4 }
   0xa   :  { %303 = vmatpush.msrb.mxu0 %v27_v0  ;;  %364 = vmatpush.msrb.mxu1 %v27_v0  ;;  %v36_v16 = vmul.f32 -0.2, %v29_v6  ;;  %v30_v18 = vld [vmem:[#allocation5] sm:$0xff] }
   0xb   :  { %v33_v8 = vadd.f32 %v32_v7, %v29_v6  ;;  %425 = vmatpush.msrb.mxu2 %v27_v0  ;;  %486 = vmatpush.msrb.mxu3 %v27_v0  ;;  %v31_v20 = vld [vmem:[#allocation6] sm:$0xff]  ;;  %v72_v21 = vsub.f32 0.0, %v30_v18  ;;  %v547_v7 = vld [vmem:[%s851_s0 + $0x10] sm:$0xff] }
   0xc   :  { %304 = vmatpush.msrb.mxu0 %v26_v1  ;;  %365 = vmatpush.msrb.mxu1 %v26_v1  ;;  %v37_v17 = vadd.f32 %v36_v16, %v29_v6  ;;  %v76_v37 = vmul.f32 -0.2, %v31_v20 }
   0xd   :  { %v34_v9 = vmul.f32 0.1, %v33_v8  ;;  %426 = vmatpush.msrb.mxu2 %v26_v1  ;;  %487 = vmatpush.msrb.mxu3 %v26_v1  ;;  %v73_v22 = vadd.f32 %v72_v21, %v31_v20 }
   0xe   :  { %305 = vmatpush.msrb.mxu0 %v25_v3  ;;  %366 = vmatpush.msrb.mxu1 %v25_v3  ;;  %v70_v23 = vadd.f32 %v69_v19, %v37_v17  ;;  %v77_v38 = vadd.f32 %v76_v37, %v31_v20 }
   0xf   :  { %v35_v10 = vadd.f32 %v34_v9, %v28_v5  ;;  %427 = vmatpush.msrb.mxu2 %v25_v3  ;;  %488 = vmatpush.msrb.mxu3 %v25_v3  ;;  %v74_v24 = vmul.f32 0.1, %v73_v22 }
  0x10   :  { %306 = vmatpush.msrb.mxu0 %v24_v4  ;;  %367 = vmatpush.msrb.mxu1 %v24_v4 }
  0x11   :  { %vm38_vm1 = vcmp.gt.f32.partialorder %v35_v10, 1.0  ;;  %428 = vmatpush.msrb.mxu2 %v24_v4  ;;  %489 = vmatpush.msrb.mxu3 %v24_v4  ;;  %v75_v27 = vadd.f32 %v74_v24, %v30_v18 }
  0x12   :  { %v532_v11 = vsel %vm38_vm1, 1.0, %v595_v2 }
  0x13   :  { %v41_v12 = vsub.f32 1.0, %v532_v11  ;;  %v43_v13 = vmul.f32 0.0, %v532_v11  ;;  %533 = vmatmul.msk.f32.vlgmr.msra.gmra.mxu0 %vm17_vm0, %v532_v11  ;;  %83 = vst.msk [vmem:[%s850_s2] sm:$0xff] %vm17_vm0, %v532_v11  ;;  %v132_v39 = vsub.f32 0.0, %v75_v27 }
  0x14   :  { %89 = vst.msk [vmem:[%s852_s3] sm:$0xff] %vm21_vm2, %v75_v27 }
  0x15   :  { %v42_v14 = vmul.f32 %v41_v12, %v35_v10 }
  0x17   :  { %v44_v15 = vadd.f32 %v43_v13, %v42_v14 }
  0x19   :  { %534 = vst.msk [vmem:[%s850_s2 + $0x8] sm:$0xff] %vm17_vm0, %v44_v15  ;;  %v92_v25 = vsub.f32 0.0, %v44_v15 }
  0x90   :  { %v66_v26 = vpop.f32.mrf.mxu0 }
  0x91   :  { %v71_v28 = vadd.f32 %v70_v23, %v66_v26  ;;  %79 = vrot.lane.b32.xlu0 %v66_v26, %s596_s25 }
  0x93   :  { %535 = vst.msk [vmem:[%s850_s2 + $0x10] sm:$0xff] %vm17_vm0, %v71_v28  ;;  %v93_v29 = vadd.f32 %v92_v25, %v71_v28  ;;  %v96_v45 = vmul.f32 -0.2, %v71_v28 }
  0x95   :  { %v94_v30 = vmul.f32 0.1, %v93_v29  ;;  %v97_v46 = vadd.f32 %v96_v45, %v71_v28 }
  0x97   :  { %v95_v31 = vadd.f32 %v94_v30, %v44_v15  ;;  %v130_v48 = vadd.f32 %v539_v47, %v97_v46  ;;  %v555_v30 = vld [vmem:[%s851_s0 + $0x18] sm:$0xff] }
  0x99   :  { %vm98_vm3 = vcmp.gt.f32.partialorder %v95_v31, 1.0 }
  0x9a   :  { %v537_v32 = vsel %vm98_vm3, 1.0, %v595_v2 }
  0x9b   :  { %v101_v33 = vsub.f32 1.0, %v537_v32  ;;  %538 = vmatmul.msk.f32.vlgmr.msra.gmra.mxu1 %vm17_vm0, %v537_v32  ;;  %540 = vst.msk [vmem:[%s850_s2 + $0x18] sm:$0xff] %vm17_vm0, %v537_v32  ;;  %v103_v35 = vmul.f32 0.0, %v537_v32 }
  0x9d   :  { %v102_v34 = vmul.f32 %v101_v33, %v95_v31 }
  0x9f   :  { %v104_v36 = vadd.f32 %v103_v35, %v102_v34 }
  0xa1   :  { %541 = vst.msk [vmem:[%s850_s2 + $0x20] sm:$0xff] %vm17_vm0, %v104_v36  ;;  %v153_v51 = vsub.f32 0.0, %v104_v36 }
 0x103   :  { %v80_v40 = vpop.permute.xlu0 %79 }
 0x104   :  { %v82_v41 = vadd.f32 %v80_v40, %v77_v38 }
 0x106   :  { %536 = vst.msk [vmem:[%s852_s3 + $0x8] sm:$0xff] %vm21_vm2, %v82_v41  ;;  %v133_v42 = vadd.f32 %v132_v39, %v82_v41  ;;  %v136_v60 = vmul.f32 -0.2, %v82_v41 }
 0x108   :  { %v134_v43 = vmul.f32 0.1, %v133_v42  ;;  %v137_v61 = vadd.f32 %v136_v60, %v82_v41 }
 0x10a   :  { %v135_v44 = vadd.f32 %v134_v43, %v75_v27 }
 0x10c   :  { %543 = vst.msk [vmem:[%s852_s3 + $0x10] sm:$0xff] %vm21_vm2, %v135_v44  ;;  %v193_v63 = vsub.f32 0.0, %v135_v44 }
 0x118   :  { %v125_v49 = vpop.f32.mrf.mxu1 }
 0x119   :  { %v131_v50 = vadd.f32 %v130_v48, %v125_v49  ;;  %139 = vrot.lane.b32.xlu0 %v125_v49, %s596_s25 }
 0x11b   :  { %542 = vst.msk [vmem:[%s850_s2 + $0x28] sm:$0xff] %vm17_vm0, %v131_v50  ;;  %v154_v52 = vadd.f32 %v153_v51, %v131_v50  ;;  %v157_v5 = vmul.f32 -0.2, %v131_v50 }
 0x11d   :  { %v155_v53 = vmul.f32 0.1, %v154_v52  ;;  %v158_v6 = vadd.f32 %v157_v5, %v131_v50 }
 0x11f   :  { %v156_v54 = vadd.f32 %v155_v53, %v104_v36  ;;  %v191_v8 = vadd.f32 %v547_v7, %v158_v6  ;;  %v563_v53 = vld [vmem:[%s851_s0 + $0x20] sm:$0xff] }
 0x121   :  { %vm159_vm4 = vcmp.gt.f32.partialorder %v156_v54, 1.0 }
 0x122   :  { %v545_v55 = vsel %vm159_vm4, 1.0, %v595_v2 }
 0x123   :  { %v162_v56 = vsub.f32 1.0, %v545_v55  ;;  %546 = vmatmul.msk.f32.vlgmr.msra.gmra.mxu2 %vm17_vm0, %v545_v55  ;;  %548 = vst.msk [vmem:[%s850_s2 + $0x30] sm:$0xff] %vm17_vm0, %v545_v55  ;;  %v164_v58 = vmul.f32 0.0, %v545_v55 }
 0x125   :  { %v163_v57 = vmul.f32 %v162_v56, %v156_v54 }
 0x127   :  { %v165_v59 = vadd.f32 %v164_v58, %v163_v57 }
 0x129   :  { %549 = vst.msk [vmem:[%s850_s2 + $0x38] sm:$0xff] %vm17_vm0, %v165_v59  ;;  %v214_v11 = vsub.f32 0.0, %v165_v59 }
 0x18b   :  { %v140_v62 = vpop.permute.xlu0 %139 }
 0x18c   :  { %v142_v0 = vadd.f32 %v140_v62, %v137_v61 }
 0x18e   :  { %544 = vst.msk [vmem:[%s852_s3 + $0x18] sm:$0xff] %vm21_vm2, %v142_v0  ;;  %v194_v1 = vadd.f32 %v193_v63, %v142_v0  ;;  %v197_v20 = vmul.f32 -0.2, %v142_v0 }
 0x190   :  { %v195_v3 = vmul.f32 0.1, %v194_v1  ;;  %v198_v21 = vadd.f32 %v197_v20, %v142_v0 }
 0x192   :  { %v196_v4 = vadd.f32 %v195_v3, %v135_v44 }
 0x194   :  { %551 = vst.msk [vmem:[%s852_s3 + $0x20] sm:$0xff] %vm21_vm2, %v196_v4  ;;  %v254_v23 = vsub.f32 0.0, %v196_v4 }
 0x1a6   :  { %v186_v9 = vpop.f32.mrf.mxu2 }
 0x1a7   :  { %v192_v10 = vadd.f32 %v191_v8, %v186_v9  ;;  %200 = vrot.lane.b32.xlu1 %v186_v9, %s596_s25 }
 0x1a9   :  { %550 = vst.msk [vmem:[%s850_s2 + $0x40] sm:$0xff] %vm17_vm0, %v192_v10  ;;  %v215_v12 = vadd.f32 %v214_v11, %v192_v10  ;;  %v218_v28 = vmul.f32 -0.2, %v192_v10 }
 0x1ab   :  { %v216_v13 = vmul.f32 0.1, %v215_v12  ;;  %v219_v29 = vadd.f32 %v218_v28, %v192_v10 }
 0x1ad   :  { %v217_v14 = vadd.f32 %v216_v13, %v165_v59  ;;  %v252_v31 = vadd.f32 %v555_v30, %v219_v29  ;;  %v571_v13 = vld [vmem:[%s851_s0 + $0x28] sm:$0xff] }
 0x1af   :  { %vm220_vm5 = vcmp.gt.f32.partialorder %v217_v14, 1.0 }
 0x1b0   :  { %v553_v15 = vsel %vm220_vm5, 1.0, %v595_v2 }
 0x1b1   :  { %v223_v16 = vsub.f32 1.0, %v553_v15  ;;  %554 = vmatmul.msk.f32.vlgmr.msra.gmra.mxu3 %vm17_vm0, %v553_v15  ;;  %556 = vst.msk [vmem:[%s850_s2 + $0x48] sm:$0xff] %vm17_vm0, %v553_v15  ;;  %v225_v18 = vmul.f32 0.0, %v553_v15 }
 0x1b3   :  { %v224_v17 = vmul.f32 %v223_v16, %v217_v14 }
 0x1b5   :  { %v226_v19 = vadd.f32 %v225_v18, %v224_v17 }
 0x1b7   :  { %557 = vst.msk [vmem:[%s850_s2 + $0x50] sm:$0xff] %vm17_vm0, %v226_v19  ;;  %v275_v34 = vsub.f32 0.0, %v226_v19 }
 0x219   :  { %v201_v22 = vpop.permute.xlu1 %200 }
 0x21a   :  { %v203_v24 = vadd.f32 %v201_v22, %v198_v21 }
 0x21c   :  { %552 = vst.msk [vmem:[%s852_s3 + $0x28] sm:$0xff] %vm21_vm2, %v203_v24  ;;  %v255_v25 = vadd.f32 %v254_v23, %v203_v24  ;;  %v258_v43 = vmul.f32 -0.2, %v203_v24 }
 0x21e   :  { %v256_v26 = vmul.f32 0.1, %v255_v25  ;;  %v259_v44 = vadd.f32 %v258_v43, %v203_v24 }
 0x220   :  { %v257_v27 = vadd.f32 %v256_v26, %v196_v4 }
 0x222   :  { %559 = vst.msk [vmem:[%s852_s3 + $0x30] sm:$0xff] %vm21_vm2, %v257_v27  ;;  %v315_v46 = vsub.f32 0.0, %v257_v27 }
 0x234   :  { %v247_v32 = vpop.f32.mrf.mxu3 }
 0x235   :  { %v253_v33 = vadd.f32 %v252_v31, %v247_v32  ;;  %261 = vrot.lane.b32.xlu1 %v247_v32, %s596_s25 }
 0x237   :  { %558 = vst.msk [vmem:[%s850_s2 + $0x58] sm:$0xff] %vm17_vm0, %v253_v33  ;;  %v276_v35 = vadd.f32 %v275_v34, %v253_v33  ;;  %v279_v51 = vmul.f32 -0.2, %v253_v33 }
 0x239   :  { %v277_v36 = vmul.f32 0.1, %v276_v35  ;;  %v280_v52 = vadd.f32 %v279_v51, %v253_v33 }
 0x23b   :  { %v278_v37 = vadd.f32 %v277_v36, %v226_v19  ;;  %v313_v54 = vadd.f32 %v563_v53, %v280_v52  ;;  %v579_v36 = vld [vmem:[%s851_s0 + $0x30] sm:$0xff] }
 0x23d   :  { %vm281_vm6 = vcmp.gt.f32.partialorder %v278_v37, 1.0 }
 0x23e   :  { %v561_v38 = vsel %vm281_vm6, 1.0, %v595_v2 }
 0x23f   :  { %v284_v39 = vsub.f32 1.0, %v561_v38  ;;  %562 = vmatmul.msk.f32.vlgmr.msrb.gmra.mxu0 %vm17_vm0, %v561_v38  ;;  %564 = vst.msk [vmem:[%s850_s2 + $0x60] sm:$0xff] %vm17_vm0, %v561_v38  ;;  %v286_v41 = vmul.f32 0.0, %v561_v38 }
 0x241   :  { %v285_v40 = vmul.f32 %v284_v39, %v278_v37 }
 0x243   :  { %v287_v42 = vadd.f32 %v286_v41, %v285_v40 }
 0x245   :  { %565 = vst.msk [vmem:[%s850_s2 + $0x68] sm:$0xff] %vm17_vm0, %v287_v42  ;;  %v336_v57 = vsub.f32 0.0, %v287_v42 }
 0x2a7   :  { %v262_v45 = vpop.permute.xlu1 %261 }
 0x2a8   :  { %v264_v47 = vadd.f32 %v262_v45, %v259_v44 }
 0x2aa   :  { %560 = vst.msk [vmem:[%s852_s3 + $0x38] sm:$0xff] %vm21_vm2, %v264_v47  ;;  %v316_v48 = vadd.f32 %v315_v46, %v264_v47  ;;  %v319_v3 = vmul.f32 -0.2, %v264_v47 }
 0x2ac   :  { %v317_v49 = vmul.f32 0.1, %v316_v48  ;;  %v320_v4 = vadd.f32 %v319_v3, %v264_v47 }
 0x2ae   :  { %v318_v50 = vadd.f32 %v317_v49, %v257_v27 }
 0x2b0   :  { %567 = vst.msk [vmem:[%s852_s3 + $0x40] sm:$0xff] %vm21_vm2, %v318_v50  ;;  %v376_v6 = vsub.f32 0.0, %v318_v50 }
 0x2bc   :  { %v308_v55 = vpop.f32.mrf.mxu0 }
 0x2bd   :  { %v314_v56 = vadd.f32 %v313_v54, %v308_v55  ;;  %322 = vrot.lane.b32.xlu2 %v308_v55, %s596_s25 }
 0x2bf   :  { %566 = vst.msk [vmem:[%s850_s2 + $0x70] sm:$0xff] %vm17_vm0, %v314_v56  ;;  %v337_v58 = vadd.f32 %v336_v57, %v314_v56  ;;  %v340_v11 = vmul.f32 -0.2, %v314_v56 }
 0x2c1   :  { %v338_v59 = vmul.f32 0.1, %v337_v58  ;;  %v341_v12 = vadd.f32 %v340_v11, %v314_v56  ;;  %v587_v58 = vld [vmem:[%s851_s0 + $0x38] sm:$0xff] }
 0x2c3   :  { %v339_v60 = vadd.f32 %v338_v59, %v287_v42  ;;  %v374_v14 = vadd.f32 %v571_v13, %v341_v12 }
 0x2c5   :  { %vm342_vm7 = vcmp.gt.f32.partialorder %v339_v60, 1.0 }
 0x2c6   :  { %v569_v61 = vsel %vm342_vm7, 1.0, %v595_v2 }
 0x2c7   :  { %v345_v62 = vsub.f32 1.0, %v569_v61  ;;  %570 = vmatmul.msk.f32.vlgmr.msrb.gmra.mxu1 %vm17_vm0, %v569_v61  ;;  %572 = vst.msk [vmem:[%s850_s2 + $0x78] sm:$0xff] %vm17_vm0, %v569_v61  ;;  %v347_v0 = vmul.f32 0.0, %v569_v61 }
 0x2c9   :  { %v346_v63 = vmul.f32 %v345_v62, %v339_v60 }
 0x2cb   :  { %v348_v1 = vadd.f32 %v347_v0, %v346_v63 }
 0x2cd   :  { %573 = vst.msk [vmem:[%s850_s2 + $0x80] sm:$0xff] %vm17_vm0, %v348_v1  ;;  %v397_v17 = vsub.f32 0.0, %v348_v1 }
 0x317   :  { %v323_v5 = vpop.permute.xlu2 %322 }
 0x318   :  { %v325_v7 = vadd.f32 %v323_v5, %v320_v4 }
 0x31a   :  { %568 = vst.msk [vmem:[%s852_s3 + $0x48] sm:$0xff] %vm21_vm2, %v325_v7  ;;  %v377_v8 = vadd.f32 %v376_v6, %v325_v7  ;;  %v380_v26 = vmul.f32 -0.2, %v325_v7 }
 0x31c   :  { %v378_v9 = vmul.f32 0.1, %v377_v8  ;;  %v381_v27 = vadd.f32 %v380_v26, %v325_v7 }
 0x31e   :  { %v379_v10 = vadd.f32 %v378_v9, %v318_v50 }
 0x320   :  { %575 = vst.msk [vmem:[%s852_s3 + $0x50] sm:$0xff] %vm21_vm2, %v379_v10  ;;  %v437_v29 = vsub.f32 0.0, %v379_v10 }
 0x344   :  { %v369_v15 = vpop.f32.mrf.mxu1 }
 0x345   :  { %v375_v16 = vadd.f32 %v374_v14, %v369_v15  ;;  %383 = vrot.lane.b32.xlu2 %v369_v15, %s596_s25 }
 0x347   :  { %574 = vst.msk [vmem:[%s850_s2 + $0x88] sm:$0xff] %vm17_vm0, %v375_v16  ;;  %v398_v18 = vadd.f32 %v397_v17, %v375_v16  ;;  %v401_v34 = vmul.f32 -0.2, %v375_v16 }
 0x349   :  { %v399_v19 = vmul.f32 0.1, %v398_v18  ;;  %v402_v35 = vadd.f32 %v401_v34, %v375_v16 }
 0x34b   :  { %v400_v20 = vadd.f32 %v399_v19, %v348_v1  ;;  %v435_v37 = vadd.f32 %v579_v36, %v402_v35 }
 0x34d   :  { %vm403_vm8 = vcmp.gt.f32.partialorder %v400_v20, 1.0 }
 0x34e   :  { %v577_v21 = vsel %vm403_vm8, 1.0, %v595_v2 }
 0x34f   :  { %v406_v22 = vsub.f32 1.0, %v577_v21  ;;  %578 = vmatmul.msk.f32.vlgmr.msrb.gmra.mxu2 %vm17_vm0, %v577_v21  ;;  %580 = vst.msk [vmem:[%s850_s2 + $0x90] sm:$0xff] %vm17_vm0, %v577_v21  ;;  %v408_v24 = vmul.f32 0.0, %v577_v21 }
 0x351   :  { %v407_v23 = vmul.f32 %v406_v22, %v400_v20 }
 0x353   :  { %v409_v25 = vadd.f32 %v408_v24, %v407_v23 }
 0x355   :  { %581 = vst.msk [vmem:[%s850_s2 + $0x98] sm:$0xff] %vm17_vm0, %v409_v25  ;;  %v458_v40 = vsub.f32 0.0, %v409_v25 }
 0x39f   :  { %v384_v28 = vpop.permute.xlu2 %383 }
 0x3a0   :  { %v386_v30 = vadd.f32 %v384_v28, %v381_v27 }
 0x3a2   :  { %576 = vst.msk [vmem:[%s852_s3 + $0x58] sm:$0xff] %vm21_vm2, %v386_v30  ;;  %v438_v31 = vadd.f32 %v437_v29, %v386_v30  ;;  %v441_v49 = vmul.f32 -0.2, %v386_v30 }
 0x3a4   :  { %v439_v32 = vmul.f32 0.1, %v438_v31 }
 0x3a6   :  { %v440_v33 = vadd.f32 %v439_v32, %v379_v10 }
 0x3a8   :  { %583 = vst.msk [vmem:[%s852_s3 + $0x60] sm:$0xff] %vm21_vm2, %v440_v33  ;;  %v498_v51 = vsub.f32 0.0, %v440_v33 }
 0x3d2   :  { %v430_v38 = vpop.f32.mrf.mxu2 }
 0x3d3   :  { %v436_v39 = vadd.f32 %v435_v37, %v430_v38  ;;  %444 = vrot.lane.b32.xlu0 %v430_v38, %s596_s25 }
 0x3d5   :  { %582 = vst.msk [vmem:[%s850_s2 + $0xa0] sm:$0xff] %vm17_vm0, %v436_v39  ;;  %v459_v41 = vadd.f32 %v458_v40, %v436_v39  ;;  %v462_v56 = vmul.f32 -0.2, %v436_v39 }
 0x3d7   :  { %v460_v42 = vmul.f32 0.1, %v459_v41  ;;  %v463_v57 = vadd.f32 %v462_v56, %v436_v39 }
 0x3d9   :  { %v461_v43 = vadd.f32 %v460_v42, %v409_v25  ;;  %v496_v59 = vadd.f32 %v587_v58, %v463_v57 }
 0x3db   :  { %vm464_vm9 = vcmp.gt.f32.partialorder %v461_v43, 1.0 }
 0x3dc   :  { %v585_v44 = vsel %vm464_vm9, 1.0, %v595_v2  ;;  %v442_v2 = vadd.f32 %v441_v49, %v386_v30 }
 0x3dd   :  { %v467_v45 = vsub.f32 1.0, %v585_v44  ;;  %586 = vmatmul.msk.f32.vlgmr.msrb.gmra.mxu3 %vm17_vm0, %v585_v44  ;;  %588 = vst.msk [vmem:[%s850_s2 + $0xa8] sm:$0xff] %vm17_vm0, %v585_v44  ;;  %v469_v47 = vmul.f32 0.0, %v585_v44 }
 0x3df   :  { %v468_v46 = vmul.f32 %v467_v45, %v461_v43 }
 0x3e1   :  { %v470_v48 = vadd.f32 %v469_v47, %v468_v46 }
 0x3e3   :  { %589 = vst.msk [vmem:[%s850_s2 + $0xb0] sm:$0xff] %vm17_vm0, %v470_v48 }
 0x3e4   :  { %520 = vst.msk [vmem:[#allocation3] sm:$0xff] %vm17_vm0, %v470_v48 }
 0x445   :  { %v445_v50 = vpop.permute.xlu0 %444 }
 0x446   :  { %v447_v52 = vadd.f32 %v445_v50, %v442_v2 }
 0x448   :  { %584 = vst.msk [vmem:[%s852_s3 + $0x68] sm:$0xff] %vm21_vm2, %v447_v52  ;;  %v499_v53 = vadd.f32 %v498_v51, %v447_v52  ;;  %v502_v62 = vmul.f32 -0.2, %v447_v52 }
 0x44a   :  { %v500_v54 = vmul.f32 0.1, %v499_v53  ;;  %v503_v63 = vadd.f32 %v502_v62, %v447_v52 }
 0x44c   :  { %v501_v55 = vadd.f32 %v500_v54, %v440_v33 }
 0x44e   :  { %591 = vst.msk [vmem:[%s852_s3 + $0x70] sm:$0xff] %vm21_vm2, %v501_v55 }
 0x44f   :  { %522 = vst.msk [vmem:[#allocation5] sm:$0xff] %vm21_vm2, %v501_v55 }
 0x460   :  { %v491_v60 = vpop.f32.mrf.mxu3 }
 0x461   :  { %v497_v61 = vadd.f32 %v496_v59, %v491_v60  ;;  %505 = vrot.lane.b32.xlu1 %v491_v60, %s596_s25 }
 0x463   :  { %590 = vst.msk [vmem:[%s850_s2 + $0xb8] sm:$0xff] %vm17_vm0, %v497_v61 }
 0x464   :  { %521 = vst.msk [vmem:[#allocation4] sm:$0xff] %vm17_vm0, %v497_v61 }
 0x4d3   :  { %v506_v0 = vpop.permute.xlu1 %505 }
 0x4d4   :  { %v508_v1 = vadd.f32 %v506_v0, %v503_v63 }
 0x4d6   :  { %592 = vst.msk [vmem:[%s852_s3 + $0x78] sm:$0xff] %vm21_vm2, %v508_v1 }
 0x4d7   :  { %523 = vst.msk [vmem:[#allocation6] sm:$0xff] %vm21_vm2, %v508_v1 }

</bundles_post_ra>
